<compile_context>
chip_gen: v5e
topology: v5e:2x2
jax: 0.10.0
libtpu: 0.0.40
codegen_flags: <defaults>
</compile_context>

<pallas_src>
import jax
import jax.numpy as jnp
import numpy as np
from jax import lax
from jax.experimental import pallas as pl
from jax.experimental.pallas import tpu as pltpu


def _lora_qkv_conv_kernel(x_ref, wqkv_ref, bqkv_ref, wa_ref, w3_ref, o_ref):
    """One (row_tile, W) spatial tile of one image.

    x_ref    : (1, H, W, C)        f32   full image (resident across row tiles)
    wqkv_ref : (C, 3C)             bf16  base qkv weight with linear LoRA folded in
    bqkv_ref : (1, 3C)             f32   qkv bias with (b3+b1)@wb folded in
    wa_ref   : (C, 2r)             bf16  [wa_q^T | wa_v^T]
    w3_ref   : (k_pad, 3C)         bf16  im2col 3x3 taps (wb folded, zero-padded rows)
    o_ref    : (1, TH, W, 3C)      out tile
    """
    _, H, W, C = x_ref.shape
    _, TH, _, three_c = o_ref.shape
    two_r = wa_ref.shape[1]
    k_pad = w3_ref.shape[0]
    k_taps = 9 * two_r
    bf16 = jnp.bfloat16

    ht = pl.program_id(1)
    r0 = pl.multiple_of(ht * TH, TH)

    # --- tile rows of x; cast to bf16 in-kernel (no wrapper-side cast pass) ---
    xt = x_ref[0, pl.ds(r0, TH), :, :].reshape(TH * W, C).astype(bf16)

    # --- LoRA-A for the tile + 1-row halos (boundary rows masked to zero) ----
    a_t = jnp.dot(xt, wa_ref[...], preferred_element_type=jnp.float32)   # (TH*W, 2r)
    top_i = jnp.maximum(r0 - 1, 0)
    bot_i = jnp.minimum(r0 + TH, H - 1)
    x_top = x_ref[0, pl.ds(top_i, 1), :, :].reshape(W, C).astype(bf16)
    x_bot = x_ref[0, pl.ds(bot_i, 1), :, :].reshape(W, C).astype(bf16)
    a_top = jnp.dot(x_top, wa_ref[...], preferred_element_type=jnp.float32)  # (W, 2r)
    a_bot = jnp.dot(x_bot, wa_ref[...], preferred_element_type=jnp.float32)  # (W, 2r)
    a_top = jnp.where(r0 > 0, a_top, 0.0)
    a_bot = jnp.where(r0 + TH < H, a_bot, 0.0)

    # --- per-tile zero-padded slab, bf16 (tiny: (TH+2, W+2, 2r)) -------------
    a_rows = jnp.concatenate(
        [a_top.reshape(1, W, two_r),
         a_t.reshape(TH, W, two_r),
         a_bot.reshape(1, W, two_r)], axis=0).astype(bf16)               # (TH+2, W, 2r)
    zcol = jnp.zeros((TH + 2, 1, two_r), bf16)
    padded = jnp.concatenate([zcol, a_rows, zcol], axis=1)               # (TH+2, W+2, 2r)

    # --- im2col: 9 static tap slices (+ zero tail to k_pad) -> one MXU operand
    taps = [padded[kh:kh + TH, kw:kw + W, :] for kh in range(3) for kw in range(3)]
    if k_pad > k_taps:
        taps.append(jnp.zeros((TH, W, k_pad - k_taps), bf16))
    cols = jnp.concatenate(taps, axis=-1).reshape(TH * W, k_pad)         # bf16

    # --- lane-dense accumulate-and-store (no q/k/v slicing, no concat) -------
    out = jnp.dot(xt, wqkv_ref[...], preferred_element_type=jnp.float32)
    out = out + bqkv_ref[...]
    out = out + jnp.dot(cols, w3_ref[...], preferred_element_type=jnp.float32)
    o_ref[0] = out.reshape(TH, W, three_c).astype(o_ref.dtype)


def _fold_params(p, C, r, k_pad):
    """Host-side (one-time) algebraic folding of the LoRA-conv parameters."""
    f32 = jnp.float32
    wqkv_t = p["wqkv"].T.astype(f32)                                   # (C, 3C)
    bqkv = p["bqkv"].astype(f32)                                       # (3C,)
    eye = jnp.eye(r, dtype=f32)

    def branch(wa, wb, w3, b3, w1, b1):
        wa_t = wa.T.astype(f32)                                        # (C, r)
        wb_t = wb.T.astype(f32)                                        # (r, C)
        w1_t = w1[:, :, 0, 0].T.astype(f32)                            # (r, r) in->out
        dW = wa_t @ (w1_t + eye) @ wb_t                                # (C, C)
        db = (b3.astype(f32) + b1.astype(f32)) @ wb_t                  # (C,)
        # (out,in,kh,kw) -> (tap, in, out), tap = kh*3+kw  (cross-correlation)
        w3_t = jnp.transpose(w3.astype(f32), (2, 3, 1, 0)).reshape(9, r, r)
        w3_fold = jnp.einsum("tio,oc->tic", w3_t, wb_t)                # (9, r, C)
        return wa_t, dW, db, w3_fold

    waq_t, dWq, dbq, w3q_f = branch(p["wa_q"], p["wb_q"], p["w3_q"],
                                    p["b3_q"], p["w1_q"], p["b1_q"])
    wav_t, dWv, dbv, w3v_f = branch(p["wa_v"], p["wb_v"], p["w3_v"],
                                    p["b3_v"], p["w1_v"], p["b1_v"])

    wqkv_fold = wqkv_t.at[:, :C].add(dWq).at[:, 2 * C:].add(dWv)       # (C, 3C)
    bqkv_fold = bqkv.at[:C].add(dbq).at[2 * C:].add(dbv).reshape(1, 3 * C)

    wa_joint = jnp.concatenate([waq_t, wav_t], axis=1)                 # (C, 2r)

    # im2col weight: per tap, q rows write cols [0,C), v rows write [2C,3C).
    zq = jnp.zeros((9, r, 2 * C), f32)
    zv = jnp.zeros((9, r, 2 * C), f32)
    w3q_pad = jnp.concatenate([w3q_f, zq], axis=2)                     # (9, r, 3C)
    w3v_pad = jnp.concatenate([zv, w3v_f], axis=2)                     # (9, r, 3C)
    w3_all = jnp.concatenate([w3q_pad, w3v_pad], axis=1).reshape(18 * r, 3 * C)
    if k_pad > 18 * r:                                                 # MXU-align K
        w3_all = jnp.concatenate(
            [w3_all, jnp.zeros((k_pad - 18 * r, 3 * C), f32)], axis=0)
    return wqkv_fold, bqkv_fold, wa_joint, w3_all


def lora_qkv_conv(x, p, *, row_tile=None, out_dtype=jnp.float32):
    """x: (B, H, W, C) float32.  p: dict of torch-layout parameters."""
    B, H, W, C = x.shape
    r = p["wa_q"].shape[0]
    three_c = 3 * C
    two_r = 2 * r
    k_pad = max(128, ((18 * r + 127) // 128) * 128)   # im2col K, padded to 128 lanes

    if row_tile is None:
        # ~512 output pixels per tile to amortize per-step overhead; must divide H.
        target = max(1, min(H, pl.cdiv(512, W)))
        row_tile = next(t for t in range(target, 0, -1) if H % t == 0)
    assert H % row_tile == 0, "row_tile must divide H"
    nt = H // row_tile

    wqkv_f, bqkv_f, wa_j, w3_all = _fold_params(p, C, r, k_pad)
    bf16 = jnp.bfloat16
    wqkv_bf = wqkv_f.astype(bf16)
    wa_bf = wa_j.astype(bf16)
    w3_bf = w3_all.astype(bf16)

    out_bytes = np.dtype(out_dtype).itemsize
    # rough VMEM budget: double-buffered x image + out tile, resident weights, slack
    est = (2 * H * W * C * x.dtype.itemsize
           + 2 * row_tile * W * three_c * out_bytes
           + 2 * (C * three_c + k_pad * three_c + C * two_r) * 2
           + three_c * 4
           + (row_tile + 2) * (W + 2) * two_r * 2
           + row_tile * W * k_pad * 2)
    vmem_limit = int(min(100 * 2 ** 20, max(32 * 2 ** 20, 2 * est)))

    cost = pl.CostEstimate(
        flops=int(2 * B * H * W * C * three_c
                  + 2 * B * H * W * C * two_r
                  + 2 * B * H * W * k_pad * three_c),
        transcendentals=0,
        bytes_accessed=int(B * H * W * C * x.dtype.itemsize
                           + B * H * W * three_c * out_bytes
                           + (C * three_c + k_pad * three_c + C * two_r) * 2
                           + three_c * 4))

    def build(single_buffer_weights):
        kw = {}
        if single_buffer_weights and hasattr(pl, "Buffered"):
            kw = dict(pipeline_mode=pl.Buffered(1))     # weights never change -> 1 buffer

        def const(shape):
            return pl.BlockSpec(shape, lambda b, t: (0,) * len(shape), **kw)

        grid_spec = pltpu.PrefetchScalarGridSpec(
            num_scalar_prefetch=0,
            grid=(B, nt),
            in_specs=[
                pl.BlockSpec((1, H, W, C), lambda b, t: (b, 0, 0, 0)),   # x: resident per image
                const((C, three_c)),                                     # wqkv (folded)
                const((1, three_c)),                                     # bqkv (folded)
                const((C, two_r)),                                       # [wa_q | wa_v]
                const((k_pad, three_c)),                                 # folded 3x3 taps
            ],
            out_specs=pl.BlockSpec((1, row_tile, W, three_c),
                                   lambda b, t: (b, t, 0, 0)),
        )
        return pl.pallas_call(
            _lora_qkv_conv_kernel,
            out_shape=jax.ShapeDtypeStruct((B, H, W, three_c), out_dtype),
            grid_spec=grid_spec,
            compiler_params=pltpu.CompilerParams(
                dimension_semantics=("parallel", "parallel"),
                vmem_limit_bytes=vmem_limit),
            cost_estimate=cost,
        )

    args = (x, wqkv_bf, bqkv_f, wa_bf, w3_bf)
    try:
        return build(True)(*args)
    except Exception:
        # pipeline_mode=pl.Buffered(1) not accepted by this jax build: fall back
        # to default double-buffered weight specs (correctness unaffected).
        return build(False)(*args)


def ref_forward(x, p):
    """Pure-JAX f32 reference reproducing the torch forward (for verification)."""
    B, H, W, C = x.shape
    qkv = jnp.einsum("bhwc,oc->bhwo", x, p["wqkv"]) + p["bqkv"]

    def branch(wa, w3, b3, w1, b1, wb):
        a = jnp.einsum("bhwc,rc->bhwr", x, wa)
        conv3 = lax.conv_general_dilated(
            a, jnp.transpose(w3, (2, 3, 1, 0)),
            window_strides=(1, 1), padding="SAME",
            dimension_numbers=("NHWC", "HWIO", "NHWC")) + b3
        conv1 = jnp.einsum("bhwr,or->bhwo", a, w1[:, :, 0, 0]) + b1
        mid = conv3 + conv1 + a
        return jnp.einsum("bhwr,or->bhwo", mid, wb)

    new_q = branch(p["wa_q"], p["w3_q"], p["b3_q"], p["w1_q"], p["b1_q"], p["wb_q"])
    new_v = branch(p["wa_v"], p["w3_v"], p["b3_v"], p["w1_v"], p["b1_v"], p["wb_v"])
    qkv = qkv.at[..., :C].add(new_q)
    qkv = qkv.at[..., 2 * C:].add(new_v)
    return qkv


if __name__ == "__main__":
    B, H, W, C, r = 2, 16, 16, 32, 4

    key = jax.random.PRNGKey(0)
    ks = jax.random.split(key, 16)

    def init(k, shape, scale):
        return jax.random.normal(k, shape, jnp.float32) * scale

    params = {
        "wqkv": init(ks[0], (3 * C, C), 1.0 / np.sqrt(C)),
        "bqkv": init(ks[1], (3 * C,), 0.02),
        "wa_q": init(ks[2], (r, C), 1.0 / np.sqrt(C)),
        "wa_v": init(ks[3], (r, C), 1.0 / np.sqrt(C)),
        "wb_q": init(ks[4], (C, r), 1.0 / np.sqrt(r)),
        "wb_v": init(ks[5], (C, r), 1.0 / np.sqrt(r)),
        "w3_q": init(ks[6], (r, r, 3, 3), 1.0 / np.sqrt(r * 9)),
        "b3_q": init(ks[7], (r,), 0.02),
        "w1_q": init(ks[8], (r, r, 1, 1), 1.0 / np.sqrt(r)),
        "b1_q": init(ks[9], (r,), 0.02),
        "w3_v": init(ks[10], (r, r, 3, 3), 1.0 / np.sqrt(r * 9)),
        "b3_v": init(ks[11], (r,), 0.02),
        "w1_v": init(ks[12], (r, r, 1, 1), 1.0 / np.sqrt(r)),
        "b1_v": init(ks[13], (r,), 0.02),
    }
    x = jax.random.normal(ks[14], (B, H, W, C), jnp.float32)

    # row_tile=8 -> 2 spatial tiles per image: exercises the tiled/halo path.
    out = jax.block_until_ready(lora_qkv_conv(x, params, row_tile=8))
    ref = jax.block_until_ready(ref_forward(x, params))
    # bf16 MXU operands vs f32 reference -> tolerance sized for bf16 rounding.
    np.testing.assert_allclose(np.asarray(out), np.asarray(ref), rtol=2e-2, atol=5e-2)
    print("KERNEL_OK")
</pallas_src>

<mosaic_0001>
module attributes {stable_mosaic.version = 11 : i64} {
  func.func @_lora_qkv_conv_kernel(%arg0: i32, %arg1: i32, %arg2: memref<1x16x16x32xf32, #tpu.memory_space<vmem>>, %arg3: memref<32x96xbf16, #tpu.memory_space<vmem>>, %arg4: memref<1x96xf32, #tpu.memory_space<vmem>>, %arg5: memref<32x8xbf16, #tpu.memory_space<vmem>>, %arg6: memref<128x96xbf16, #tpu.memory_space<vmem>>, %arg7: memref<1x8x16x96xf32, #tpu.memory_space<vmem>>) attributes {dimension_semantics = [#tpu.dimension_semantics<parallel>, #tpu.dimension_semantics<parallel>], iteration_bounds = array<i64: 2, 2>, scalar_prefetch = 0 : i64, scratch_operands = 0 : i64, tpu.core_type = #tpu.core_type<tc>, window_params = [{transform_indices = @transform_0, window_bounds = array<i64: 1, 16, 16, 32>}, {pipeline_mode = #tpu.pipeline_mode<synchronous>, transform_indices = @transform_1, window_bounds = array<i64: 32, 96>}, {pipeline_mode = #tpu.pipeline_mode<synchronous>, transform_indices = @transform_2, window_bounds = array<i64: 1, 96>}, {pipeline_mode = #tpu.pipeline_mode<synchronous>, transform_indices = @transform_3, window_bounds = array<i64: 32, 8>}, {pipeline_mode = #tpu.pipeline_mode<synchronous>, transform_indices = @transform_4, window_bounds = array<i64: 128, 96>}, {transform_indices = @transform_5, window_bounds = array<i64: 1, 8, 16, 96>}]} {
    %c8_i32 = arith.constant 8 : i32
    %0 = arith.muli %arg1, %c8_i32 : i32
    %1 = tpu.assume_multiple %0, 8 : i32
    %c0 = arith.constant 0 : index
    %2 = arith.index_cast %1 : i32 to index
    %c0_0 = arith.constant 0 : index
    %c0_1 = arith.constant 0 : index
    %3 = vector.load %arg2[%c0, %2, %c0_0, %c0_1] : memref<1x16x16x32xf32, #tpu.memory_space<vmem>>, vector<1x8x16x32xf32>
    %4 = vector.shape_cast %3 : vector<1x8x16x32xf32> to vector<8x16x32xf32>
    %5 = vector.shape_cast %4 : vector<8x16x32xf32> to vector<128x32xf32>
    %6 = arith.truncf %5 : vector<128x32xf32> to vector<128x32xbf16>
    %c0_2 = arith.constant 0 : index
    %c0_3 = arith.constant 0 : index
    %7 = vector.load %arg5[%c0_2, %c0_3] : memref<32x8xbf16, #tpu.memory_space<vmem>>, vector<32x8xbf16>
    %cst = arith.constant dense<0.000000e+00> : vector<128x8xf32>
    %8 = tpu.matmul %6, %7, %cst {dimension_numbers = #tpu.dot_dimension_numbers<[1], [0], [0], [1], [0, 0, 1, 1], [], []>} : vector<128x32xbf16>, vector<32x8xbf16>, vector<128x8xf32> -> vector<128x8xf32>
    %c1_i32 = arith.constant 1 : i32
    %9 = arith.subi %1, %c1_i32 : i32
    %c0_i32 = arith.constant 0 : i32
    %10 = arith.maxsi %9, %c0_i32 : i32
    %c8_i32_4 = arith.constant 8 : i32
    %11 = arith.addi %1, %c8_i32_4 : i32
    %c15_i32 = arith.constant 15 : i32
    %12 = arith.minsi %11, %c15_i32 : i32
    %c0_5 = arith.constant 0 : index
    %13 = arith.index_cast %10 : i32 to index
    %c0_6 = arith.constant 0 : index
    %c0_7 = arith.constant 0 : index
    %14 = vector.load %arg2[%c0_5, %13, %c0_6, %c0_7] : memref<1x16x16x32xf32, #tpu.memory_space<vmem>>, vector<1x1x16x32xf32>
    %15 = vector.shape_cast %14 : vector<1x1x16x32xf32> to vector<1x16x32xf32>
    %16 = vector.shape_cast %15 : vector<1x16x32xf32> to vector<16x32xf32>
    %17 = arith.truncf %16 : vector<16x32xf32> to vector<16x32xbf16>
    %c0_8 = arith.constant 0 : index
    %18 = arith.index_cast %12 : i32 to index
    %c0_9 = arith.constant 0 : index
    %c0_10 = arith.constant 0 : index
    %19 = vector.load %arg2[%c0_8, %18, %c0_9, %c0_10] : memref<1x16x16x32xf32, #tpu.memory_space<vmem>>, vector<1x1x16x32xf32>
    %20 = vector.shape_cast %19 : vector<1x1x16x32xf32> to vector<1x16x32xf32>
    %21 = vector.shape_cast %20 : vector<1x16x32xf32> to vector<16x32xf32>
    %22 = arith.truncf %21 : vector<16x32xf32> to vector<16x32xbf16>
    %c0_11 = arith.constant 0 : index
    %c0_12 = arith.constant 0 : index
    %23 = vector.load %arg5[%c0_11, %c0_12] : memref<32x8xbf16, #tpu.memory_space<vmem>>, vector<32x8xbf16>
    %cst_13 = arith.constant dense<0.000000e+00> : vector<16x8xf32>
    %24 = tpu.matmul %17, %23, %cst_13 {dimension_numbers = #tpu.dot_dimension_numbers<[1], [0], [0], [1], [0, 0, 1, 1], [], []>} : vector<16x32xbf16>, vector<32x8xbf16>, vector<16x8xf32> -> vector<16x8xf32>
    %c0_14 = arith.constant 0 : index
    %c0_15 = arith.constant 0 : index
    %25 = vector.load %arg5[%c0_14, %c0_15] : memref<32x8xbf16, #tpu.memory_space<vmem>>, vector<32x8xbf16>
    %cst_16 = arith.constant dense<0.000000e+00> : vector<16x8xf32>
    %26 = tpu.matmul %22, %25, %cst_16 {dimension_numbers = #tpu.dot_dimension_numbers<[1], [0], [0], [1], [0, 0, 1, 1], [], []>} : vector<16x32xbf16>, vector<32x8xbf16>, vector<16x8xf32> -> vector<16x8xf32>
    %c0_i32_17 = arith.constant 0 : i32
    %27 = arith.cmpi sgt, %1, %c0_i32_17 : i32
    %cst_18 = arith.constant 0.000000e+00 : f32
    %28 = vector.broadcast %cst_18 : f32 to vector<16x8xf32>
    %29 = arith.select %27, %24, %28 : vector<16x8xf32>
    %c8_i32_19 = arith.constant 8 : i32
    %30 = arith.addi %1, %c8_i32_19 : i32
    %c16_i32 = arith.constant 16 : i32
    %31 = arith.cmpi slt, %30, %c16_i32 : i32
    %cst_20 = arith.constant 0.000000e+00 : f32
    %32 = vector.broadcast %cst_20 : f32 to vector<16x8xf32>
    %33 = arith.select %31, %26, %32 : vector<16x8xf32>
    %34 = vector.shape_cast %29 : vector<16x8xf32> to vector<1x16x8xf32>
    %35 = vector.shape_cast %8 : vector<128x8xf32> to vector<8x16x8xf32>
    %36 = vector.shape_cast %33 : vector<16x8xf32> to vector<1x16x8xf32>
    %37 = tpu.concatenate %34, %35, %36 in 0 : vector<1x16x8xf32>, vector<8x16x8xf32>, vector<1x16x8xf32> -> vector<10x16x8xf32>
    %38 = arith.truncf %37 : vector<10x16x8xf32> to vector<10x16x8xbf16>
    %cst_21 = arith.constant 0.000000e+00 : bf16
    %39 = vector.broadcast %cst_21 : bf16 to vector<10x1x8xbf16>
    %40 = tpu.concatenate %39, %38, %39 in 1 : vector<10x1x8xbf16>, vector<10x16x8xbf16>, vector<10x1x8xbf16> -> vector<10x18x8xbf16>
    %41 = vector.extract_strided_slice %40 {offsets = [0, 0, 0], sizes = [8, 16, 8], strides = [1, 1, 1]} : vector<10x18x8xbf16> to vector<8x16x8xbf16>
    %42 = vector.extract_strided_slice %40 {offsets = [0, 1, 0], sizes = [8, 16, 8], strides = [1, 1, 1]} : vector<10x18x8xbf16> to vector<8x16x8xbf16>
    %43 = vector.extract_strided_slice %40 {offsets = [0, 2, 0], sizes = [8, 16, 8], strides = [1, 1, 1]} : vector<10x18x8xbf16> to vector<8x16x8xbf16>
    %44 = vector.extract_strided_slice %40 {offsets = [1, 0, 0], sizes = [8, 16, 8], strides = [1, 1, 1]} : vector<10x18x8xbf16> to vector<8x16x8xbf16>
    %45 = vector.extract_strided_slice %40 {offsets = [1, 1, 0], sizes = [8, 16, 8], strides = [1, 1, 1]} : vector<10x18x8xbf16> to vector<8x16x8xbf16>
    %46 = vector.extract_strided_slice %40 {offsets = [1, 2, 0], sizes = [8, 16, 8], strides = [1, 1, 1]} : vector<10x18x8xbf16> to vector<8x16x8xbf16>
    %47 = vector.extract_strided_slice %40 {offsets = [2, 0, 0], sizes = [8, 16, 8], strides = [1, 1, 1]} : vector<10x18x8xbf16> to vector<8x16x8xbf16>
    %48 = vector.extract_strided_slice %40 {offsets = [2, 1, 0], sizes = [8, 16, 8], strides = [1, 1, 1]} : vector<10x18x8xbf16> to vector<8x16x8xbf16>
    %49 = vector.extract_strided_slice %40 {offsets = [2, 2, 0], sizes = [8, 16, 8], strides = [1, 1, 1]} : vector<10x18x8xbf16> to vector<8x16x8xbf16>
    %cst_22 = arith.constant 0.000000e+00 : bf16
    %50 = vector.broadcast %cst_22 : bf16 to vector<8x16x56xbf16>
    %51 = tpu.concatenate %41, %42, %43, %44, %45, %46, %47, %48, %49, %50 in 2 : vector<8x16x8xbf16>, vector<8x16x8xbf16>, vector<8x16x8xbf16>, vector<8x16x8xbf16>, vector<8x16x8xbf16>, vector<8x16x8xbf16>, vector<8x16x8xbf16>, vector<8x16x8xbf16>, vector<8x16x8xbf16>, vector<8x16x56xbf16> -> vector<8x16x128xbf16>
    %52 = vector.shape_cast %51 : vector<8x16x128xbf16> to vector<128x128xbf16>
    %c0_23 = arith.constant 0 : index
    %c0_24 = arith.constant 0 : index
    %53 = vector.load %arg3[%c0_23, %c0_24] : memref<32x96xbf16, #tpu.memory_space<vmem>>, vector<32x96xbf16>
    %cst_25 = arith.constant dense<0.000000e+00> : vector<128x96xf32>
    %54 = tpu.matmul %6, %53, %cst_25 {dimension_numbers = #tpu.dot_dimension_numbers<[1], [0], [0], [1], [0, 0, 1, 1], [], []>} : vector<128x32xbf16>, vector<32x96xbf16>, vector<128x96xf32> -> vector<128x96xf32>
    %c0_26 = arith.constant 0 : index
    %c0_27 = arith.constant 0 : index
    %55 = vector.load %arg4[%c0_26, %c0_27] : memref<1x96xf32, #tpu.memory_space<vmem>>, vector<1x96xf32>
    %56 = vector.broadcast %55 : vector<1x96xf32> to vector<128x96xf32>
    %57 = arith.addf %54, %56 : vector<128x96xf32>
    %c0_28 = arith.constant 0 : index
    %c0_29 = arith.constant 0 : index
    %58 = vector.load %arg6[%c0_28, %c0_29] : memref<128x96xbf16, #tpu.memory_space<vmem>>, vector<128x96xbf16>
    %cst_30 = arith.constant dense<0.000000e+00> : vector<128x96xf32>
    %59 = tpu.matmul %52, %58, %cst_30 {dimension_numbers = #tpu.dot_dimension_numbers<[1], [0], [0], [1], [0, 0, 1, 1], [], []>} : vector<128x128xbf16>, vector<128x96xbf16>, vector<128x96xf32> -> vector<128x96xf32>
    %60 = arith.addf %57, %59 : vector<128x96xf32>
    %61 = vector.shape_cast %60 : vector<128x96xf32> to vector<8x16x96xf32>
    %c0_31 = arith.constant 0 : index
    %c0_32 = arith.constant 0 : index
    %c0_33 = arith.constant 0 : index
    %c0_34 = arith.constant 0 : index
    %62 = vector.load %arg7[%c0_31, %c0_32, %c0_33, %c0_34] : memref<1x8x16x96xf32, #tpu.memory_space<vmem>>, vector<1x8x16x96xf32>
    %63 = vector.shape_cast %62 : vector<1x8x16x96xf32> to vector<8x16x96xf32>
    %64 = vector.shape_cast %61 : vector<8x16x96xf32> to vector<1x8x16x96xf32>
    tpu.vector_store %arg7[%c0_31, %c0_32, %c0_33, %c0_34], %64 {strides = array<i32>} : memref<1x8x16x96xf32, #tpu.memory_space<vmem>>, vector<1x8x16x96xf32>,
    return
  }
  func.func @transform_0(%arg0: i32, %arg1: i32) -> (i32, i32, i32, i32) {
    %c0_i32 = arith.constant 0 : i32
    %c0_i32_0 = arith.constant 0 : i32
    %c0_i32_1 = arith.constant 0 : i32
    %c0_i32_2 = arith.constant 0 : i32
    return %arg0, %c0_i32, %c0_i32_0, %c0_i32_1 : i32, i32, i32, i32
  }
  func.func @transform_1(%arg0: i32, %arg1: i32) -> (i32, i32) {
    %c0_i32 = arith.constant 0 : i32
    %c0_i32_0 = arith.constant 0 : i32
    %c0_i32_1 = arith.constant 0 : i32
    return %c0_i32, %c0_i32_0 : i32, i32
  }
  func.func @transform_2(%arg0: i32, %arg1: i32) -> (i32, i32) {
    %c0_i32 = arith.constant 0 : i32
    %c0_i32_0 = arith.constant 0 : i32
    %c0_i32_1 = arith.constant 0 : i32
    return %c0_i32, %c0_i32_0 : i32, i32
  }
  func.func @transform_3(%arg0: i32, %arg1: i32) -> (i32, i32) {
    %c0_i32 = arith.constant 0 : i32
    %c0_i32_0 = arith.constant 0 : i32
    %c0_i32_1 = arith.constant 0 : i32
    return %c0_i32, %c0_i32_0 : i32, i32
  }
  func.func @transform_4(%arg0: i32, %arg1: i32) -> (i32, i32) {
    %c0_i32 = arith.constant 0 : i32
    %c0_i32_0 = arith.constant 0 : i32
    %c0_i32_1 = arith.constant 0 : i32
    return %c0_i32, %c0_i32_0 : i32, i32
  }
  func.func @transform_5(%arg0: i32, %arg1: i32) -> (i32, i32, i32, i32) {
    %c0_i32 = arith.constant 0 : i32
    %c0_i32_0 = arith.constant 0 : i32
    %c0_i32_1 = arith.constant 0 : i32
    return %arg0, %arg1, %c0_i32, %c0_i32_0 : i32, i32, i32, i32
  }
}

module attributes {stable_mosaic.version = 11 : i64} {
  func.func @_lora_qkv_conv_kernel(%arg0: i32, %arg1: i32, %arg2: memref<1x16x16x32xf32, #tpu.memory_space<vmem>>, %arg3: memref<32x96xbf16, #tpu.memory_space<vmem>>, %arg4: memref<1x96xf32, #tpu.memory_space<vmem>>, %arg5: memref<32x8xbf16, #tpu.memory_space<vmem>>, %arg6: memref<128x96xbf16, #tpu.memory_space<vmem>>, %arg7: memref<1x8x16x96xf32, #tpu.memory_space<vmem>>) attributes {dimension_semantics = [#tpu.dimension_semantics<parallel>, #tpu.dimension_semantics<parallel>], iteration_bounds = array<i64: 2, 2>, scalar_prefetch = 0 : i64, scratch_operands = 0 : i64, tpu.core_type = #tpu.core_type<tc>, window_params = [{transform_indices = @transform_0, window_bounds = array<i64: 1, 16, 16, 32>}, {pipeline_mode = #tpu.pipeline_mode<synchronous>, transform_indices = @transform_1, window_bounds = array<i64: 32, 96>}, {pipeline_mode = #tpu.pipeline_mode<synchronous>, transform_indices = @transform_2, window_bounds = array<i64: 1, 96>}, {pipeline_mode = #tpu.pipeline_mode<synchronous>, transform_indices = @transform_3, window_bounds = array<i64: 32, 8>}, {pipeline_mode = #tpu.pipeline_mode<synchronous>, transform_indices = @transform_4, window_bounds = array<i64: 128, 96>}, {transform_indices = @transform_5, window_bounds = array<i64: 1, 8, 16, 96>}]} {
    %c8_i32 = arith.constant 8 : i32
    %0 = arith.muli %arg1, %c8_i32 : i32
    %1 = tpu.assume_multiple %0, 8 : i32
    %c0 = arith.constant 0 : index
    %2 = arith.index_cast %1 : i32 to index
    %c0_0 = arith.constant 0 : index
    %c0_1 = arith.constant 0 : index
    %3 = vector.load %arg2[%c0, %2, %c0_0, %c0_1] : memref<1x16x16x32xf32, #tpu.memory_space<vmem>>, vector<1x8x16x32xf32>
    %4 = vector.shape_cast %3 : vector<1x8x16x32xf32> to vector<8x16x32xf32>
    %5 = vector.shape_cast %4 : vector<8x16x32xf32> to vector<128x32xf32>
    %6 = arith.truncf %5 : vector<128x32xf32> to vector<128x32xbf16>
    %c0_2 = arith.constant 0 : index
    %c0_3 = arith.constant 0 : index
    %7 = vector.load %arg5[%c0_2, %c0_3] : memref<32x8xbf16, #tpu.memory_space<vmem>>, vector<32x8xbf16>
    %cst = arith.constant dense<0.000000e+00> : vector<128x8xf32>
    %8 = tpu.matmul %6, %7, %cst {dimension_numbers = #tpu.dot_dimension_numbers<[1], [0], [0], [1], [0, 0, 1, 1], [], []>} : vector<128x32xbf16>, vector<32x8xbf16>, vector<128x8xf32> -> vector<128x8xf32>
    %c1_i32 = arith.constant 1 : i32
    %9 = arith.subi %1, %c1_i32 : i32
    %c0_i32 = arith.constant 0 : i32
    %10 = arith.maxsi %9, %c0_i32 : i32
    %c8_i32_4 = arith.constant 8 : i32
    %11 = arith.addi %1, %c8_i32_4 : i32
    %c15_i32 = arith.constant 15 : i32
    %12 = arith.minsi %11, %c15_i32 : i32
    %c0_5 = arith.constant 0 : index
    %13 = arith.index_cast %10 : i32 to index
    %c0_6 = arith.constant 0 : index
    %c0_7 = arith.constant 0 : index
    %14 = vector.load %arg2[%c0_5, %13, %c0_6, %c0_7] : memref<1x16x16x32xf32, #tpu.memory_space<vmem>>, vector<1x1x16x32xf32>
    %15 = vector.shape_cast %14 : vector<1x1x16x32xf32> to vector<1x16x32xf32>
    %16 = vector.shape_cast %15 : vector<1x16x32xf32> to vector<16x32xf32>
    %17 = arith.truncf %16 : vector<16x32xf32> to vector<16x32xbf16>
    %c0_8 = arith.constant 0 : index
    %18 = arith.index_cast %12 : i32 to index
    %c0_9 = arith.constant 0 : index
    %c0_10 = arith.constant 0 : index
    %19 = vector.load %arg2[%c0_8, %18, %c0_9, %c0_10] : memref<1x16x16x32xf32, #tpu.memory_space<vmem>>, vector<1x1x16x32xf32>
    %20 = vector.shape_cast %19 : vector<1x1x16x32xf32> to vector<1x16x32xf32>
    %21 = vector.shape_cast %20 : vector<1x16x32xf32> to vector<16x32xf32>
    %22 = arith.truncf %21 : vector<16x32xf32> to vector<16x32xbf16>
    %c0_11 = arith.constant 0 : index
    %c0_12 = arith.constant 0 : index
    %23 = vector.load %arg5[%c0_11, %c0_12] : memref<32x8xbf16, #tpu.memory_space<vmem>>, vector<32x8xbf16>
    %cst_13 = arith.constant dense<0.000000e+00> : vector<16x8xf32>
    %24 = tpu.matmul %17, %23, %cst_13 {dimension_numbers = #tpu.dot_dimension_numbers<[1], [0], [0], [1], [0, 0, 1, 1], [], []>} : vector<16x32xbf16>, vector<32x8xbf16>, vector<16x8xf32> -> vector<16x8xf32>
    %c0_14 = arith.constant 0 : index
    %c0_15 = arith.constant 0 : index
    %25 = vector.load %arg5[%c0_14, %c0_15] : memref<32x8xbf16, #tpu.memory_space<vmem>>, vector<32x8xbf16>
    %cst_16 = arith.constant dense<0.000000e+00> : vector<16x8xf32>
    %26 = tpu.matmul %22, %25, %cst_16 {dimension_numbers = #tpu.dot_dimension_numbers<[1], [0], [0], [1], [0, 0, 1, 1], [], []>} : vector<16x32xbf16>, vector<32x8xbf16>, vector<16x8xf32> -> vector<16x8xf32>
    %c0_i32_17 = arith.constant 0 : i32
    %27 = arith.cmpi sgt, %1, %c0_i32_17 : i32
    %cst_18 = arith.constant 0.000000e+00 : f32
    %28 = vector.broadcast %cst_18 : f32 to vector<16x8xf32>
    %29 = arith.select %27, %24, %28 : vector<16x8xf32>
    %c8_i32_19 = arith.constant 8 : i32
    %30 = arith.addi %1, %c8_i32_19 : i32
    %c16_i32 = arith.constant 16 : i32
    %31 = arith.cmpi slt, %30, %c16_i32 : i32
    %cst_20 = arith.constant 0.000000e+00 : f32
    %32 = vector.broadcast %cst_20 : f32 to vector<16x8xf32>
    %33 = arith.select %31, %26, %32 : vector<16x8xf32>
    %34 = vector.shape_cast %29 : vector<16x8xf32> to vector<1x16x8xf32>
    %35 = vector.shape_cast %8 : vector<128x8xf32> to vector<8x16x8xf32>
    %36 = vector.shape_cast %33 : vector<16x8xf32> to vector<1x16x8xf32>
    %37 = tpu.concatenate %34, %35, %36 in 0 : vector<1x16x8xf32>, vector<8x16x8xf32>, vector<1x16x8xf32> -> vector<10x16x8xf32>
    %38 = arith.truncf %37 : vector<10x16x8xf32> to vector<10x16x8xbf16>
    %cst_21 = arith.constant 0.000000e+00 : bf16
    %39 = vector.broadcast %cst_21 : bf16 to vector<10x1x8xbf16>
    %40 = tpu.concatenate %39, %38, %39 in 1 : vector<10x1x8xbf16>, vector<10x16x8xbf16>, vector<10x1x8xbf16> -> vector<10x18x8xbf16>
    %41 = vector.extract_strided_slice %40 {offsets = [0, 0, 0], sizes = [8, 16, 8], strides = [1, 1, 1]} : vector<10x18x8xbf16> to vector<8x16x8xbf16>
    %42 = vector.extract_strided_slice %40 {offsets = [0, 1, 0], sizes = [8, 16, 8], strides = [1, 1, 1]} : vector<10x18x8xbf16> to vector<8x16x8xbf16>
    %43 = vector.extract_strided_slice %40 {offsets = [0, 2, 0], sizes = [8, 16, 8], strides = [1, 1, 1]} : vector<10x18x8xbf16> to vector<8x16x8xbf16>
    %44 = vector.extract_strided_slice %40 {offsets = [1, 0, 0], sizes = [8, 16, 8], strides = [1, 1, 1]} : vector<10x18x8xbf16> to vector<8x16x8xbf16>
    %45 = vector.extract_strided_slice %40 {offsets = [1, 1, 0], sizes = [8, 16, 8], strides = [1, 1, 1]} : vector<10x18x8xbf16> to vector<8x16x8xbf16>
    %46 = vector.extract_strided_slice %40 {offsets = [1, 2, 0], sizes = [8, 16, 8], strides = [1, 1, 1]} : vector<10x18x8xbf16> to vector<8x16x8xbf16>
    %47 = vector.extract_strided_slice %40 {offsets = [2, 0, 0], sizes = [8, 16, 8], strides = [1, 1, 1]} : vector<10x18x8xbf16> to vector<8x16x8xbf16>
    %48 = vector.extract_strided_slice %40 {offsets = [2, 1, 0], sizes = [8, 16, 8], strides = [1, 1, 1]} : vector<10x18x8xbf16> to vector<8x16x8xbf16>
    %49 = vector.extract_strided_slice %40 {offsets = [2, 2, 0], sizes = [8, 16, 8], strides = [1, 1, 1]} : vector<10x18x8xbf16> to vector<8x16x8xbf16>
    %cst_22 = arith.constant 0.000000e+00 : bf16
    %50 = vector.broadcast %cst_22 : bf16 to vector<8x16x56xbf16>
    %51 = tpu.concatenate %41, %42, %43, %44, %45, %46, %47, %48, %49, %50 in 2 : vector<8x16x8xbf16>, vector<8x16x8xbf16>, vector<8x16x8xbf16>, vector<8x16x8xbf16>, vector<8x16x8xbf16>, vector<8x16x8xbf16>, vector<8x16x8xbf16>, vector<8x16x8xbf16>, vector<8x16x8xbf16>, vector<8x16x56xbf16> -> vector<8x16x128xbf16>
    %52 = vector.shape_cast %51 : vector<8x16x128xbf16> to vector<128x128xbf16>
    %c0_23 = arith.constant 0 : index
    %c0_24 = arith.constant 0 : index
    %53 = vector.load %arg3[%c0_23, %c0_24] : memref<32x96xbf16, #tpu.memory_space<vmem>>, vector<32x96xbf16>
    %cst_25 = arith.constant dense<0.000000e+00> : vector<128x96xf32>
    %54 = tpu.matmul %6, %53, %cst_25 {dimension_numbers = #tpu.dot_dimension_numbers<[1], [0], [0], [1], [0, 0, 1, 1], [], []>} : vector<128x32xbf16>, vector<32x96xbf16>, vector<128x96xf32> -> vector<128x96xf32>
    %c0_26 = arith.constant 0 : index
    %c0_27 = arith.constant 0 : index
    %55 = vector.load %arg4[%c0_26, %c0_27] : memref<1x96xf32, #tpu.memory_space<vmem>>, vector<1x96xf32>
    %56 = vector.broadcast %55 : vector<1x96xf32> to vector<128x96xf32>
    %57 = arith.addf %54, %56 : vector<128x96xf32>
    %c0_28 = arith.constant 0 : index
    %c0_29 = arith.constant 0 : index
    %58 = vector.load %arg6[%c0_28, %c0_29] : memref<128x96xbf16, #tpu.memory_space<vmem>>, vector<128x96xbf16>
    %cst_30 = arith.constant dense<0.000000e+00> : vector<128x96xf32>
    %59 = tpu.matmul %52, %58, %cst_30 {dimension_numbers = #tpu.dot_dimension_numbers<[1], [0], [0], [1], [0, 0, 1, 1], [], []>} : vector<128x128xbf16>, vector<128x96xbf16>, vector<128x96xf32> -> vector<128x96xf32>
    %60 = arith.addf %57, %59 : vector<128x96xf32>
    %61 = vector.shape_cast %60 : vector<128x96xf32> to vector<8x16x96xf32>
    %c0_31 = arith.constant 0 : index
    %c0_32 = arith.constant 0 : index
    %c0_33 = arith.constant 0 : index
    %c0_34 = arith.constant 0 : index
    %62 = vector.load %arg7[%c0_31, %c0_32, %c0_33, %c0_34] : memref<1x8x16x96xf32, #tpu.memory_space<vmem>>, vector<1x8x16x96xf32>
    %63 = vector.shape_cast %62 : vector<1x8x16x96xf32> to vector<8x16x96xf32>
    %64 = vector.shape_cast %61 : vector<8x16x96xf32> to vector<1x8x16x96xf32>
    tpu.vector_store %arg7[%c0_31, %c0_32, %c0_33, %c0_34], %64 {strides = array<i32>} : memref<1x8x16x96xf32, #tpu.memory_space<vmem>>, vector<1x8x16x96xf32>,
    return
  }
  func.func @transform_0(%arg0: i32, %arg1: i32) -> (i32, i32, i32, i32) {
    %c0_i32 = arith.constant 0 : i32
    %c0_i32_0 = arith.constant 0 : i32
    %c0_i32_1 = arith.constant 0 : i32
    %c0_i32_2 = arith.constant 0 : i32
    return %arg0, %c0_i32, %c0_i32_0, %c0_i32_1 : i32, i32, i32, i32
  }
  func.func @transform_1(%arg0: i32, %arg1: i32) -> (i32, i32) {
    %c0_i32 = arith.constant 0 : i32
    %c0_i32_0 = arith.constant 0 : i32
    %c0_i32_1 = arith.constant 0 : i32
    return %c0_i32, %c0_i32_0 : i32, i32
  }
  func.func @transform_2(%arg0: i32, %arg1: i32) -> (i32, i32) {
    %c0_i32 = arith.constant 0 : i32
    %c0_i32_0 = arith.constant 0 : i32
    %c0_i32_1 = arith.constant 0 : i32
    return %c0_i32, %c0_i32_0 : i32, i32
  }
  func.func @transform_3(%arg0: i32, %arg1: i32) -> (i32, i32) {
    %c0_i32 = arith.constant 0 : i32
    %c0_i32_0 = arith.constant 0 : i32
    %c0_i32_1 = arith.constant 0 : i32
    return %c0_i32, %c0_i32_0 : i32, i32
  }
  func.func @transform_4(%arg0: i32, %arg1: i32) -> (i32, i32) {
    %c0_i32 = arith.constant 0 : i32
    %c0_i32_0 = arith.constant 0 : i32
    %c0_i32_1 = arith.constant 0 : i32
    return %c0_i32, %c0_i32_0 : i32, i32
  }
  func.func @transform_5(%arg0: i32, %arg1: i32) -> (i32, i32, i32, i32) {
    %c0_i32 = arith.constant 0 : i32
    %c0_i32_0 = arith.constant 0 : i32
    %c0_i32_1 = arith.constant 0 : i32
    return %arg0, %arg1, %c0_i32, %c0_i32_0 : i32, i32, i32, i32
  }
}

</mosaic_0001>

<bundles_post_ra>
// kernel: tpu_custom_call.1
= control target key start
LH: loop header
LB: loop body
LE: loop exit
PB: predicated region body
PF: predicated region fallthrough
CT: control target
= control target key end

     0   :  { %10 = vsyncpa [#allocation3], 0  ;;  %s2512_s0 = inlined_call_operand.hbm [shape: f32[2,16,16,32], index: 0, kind: input, shape index: {}]   ;;  %s2513_s1 = inlined_call_operand.vmem [shape: bf16[32,96], index: 1, kind: input, shape index: {}]   ;;  %s2514_s2 = inlined_call_operand.vmem [shape: f32[1,96], index: 2, kind: input, shape index: {}]   ;;  %s2515_s3 = inlined_call_operand.vmem [shape: bf16[32,8], index: 3, kind: input, shape index: {}]   ;;  %s2516_s4 = inlined_call_operand.vmem [shape: bf16[128,96], index: 4, kind: input, shape index: {}]   ;;  %s2517_s5 = inlined_call_operand.hbm [shape: f32[2,16,16,96], index: 5, kind: output, shape index: {}]  }
   0x1   :  { %12 = vsyncpa [#allocation3 + $0x1], 0 }
   0x2   :  { %13 = vsyncpa [#allocation4], 0 }
   0x3   :  { %15 = vsyncpa [#allocation4 + $0x1], 0  ;;  %s1833_s18 = smov 0   ;;  %s1835_s19 = smov 0  }
   0x4   :  { %s1837_s20 = smov 0   ;;  %s1839_s21 = smov 0  }
   0x5   :  { %s1841_s22 = smov 0   ;;  %s1843_s23 = smov 0  }
   0x6   :  { %s1845_s24 = smov 0   ;;  %s1847_s25 = smov 0  }
   0x7   :  { %s1849_s26 = smov 0   ;;  %s1851_s27 = smov 0  }
   0x8   :  { %s1853_s28 = smov 0  }
   0x9 LB: > { %2522 = sst [smem:[#allocation8_spill]] %s1782_s26  ;;  %s1403_s29 = sadd.s32 4294967295, %s1790_s28   ;;  %s1790_s28 = sphi %s1853_s28, %s21_s28   ;;  %s1786_s27 = sphi %s1851_s27, %s2539_s27   ;;  %s1782_s26 = sphi %s1849_s26, %s2538_s26   ;;  %s1778_s25 = sphi %s1847_s25, %s2537_s25   ;;  %s1774_s24 = sphi %s1845_s24, %s2536_s24   ;;  %s1770_s23 = sphi %s1843_s23, %s2545_s23   ;;  %s1766_s22 = sphi %s1841_s22, %s2544_s22   ;;  %s1762_s21 = sphi %s1839_s21, %s2543_s21   ;;  %s1758_s20 = sphi %s1837_s20, %s2542_s20   ;;  %s1754_s19 = sphi %s1835_s19, %s2541_s19   ;;  %s1750_s18 = sphi %s1833_s18, %s2540_s18  }
   0xa   : > { %2523 = sst [smem:[#allocation9_spill]] %s1786_s27  ;;  %s1404_s30 = sadd.s32 4294967294, %s1790_s28  }
   0xb   : > { %s30_s6 = sadd.s32 1, %s1782_s26  ;;  %s33_s7 = sadd.s32 1, %s1786_s27 }
   0xc   : > { %p31_p0 = scmp.ge.s32.totalorder %s30_s6, 2  ;;  %s40_s8 = sadd.s32 1, %s1770_s23 }
   0xd   : > { %p47_p1 = scmp.ne.s32.totalorder %s1770_s23, %s1766_s22  ;;  %p48_p2 = scmp.eq.s32.totalorder %s1790_s28, 0 }
   0xe   : > { %s2547_s6 = smov (%p31_p0, %s30_s6), 0  ;;  %s2549_s7 = smov (!%p31_p0, %s33_s7), %s1786_s27 }
   0xf   : > { %2524 = sst [smem:[#allocation10_spill]] %s2547_s6  ;;  %p1897_p3 = por %p48_p2, %p47_p1 }
  0x10   : > { %p53_p4 = scmp.ne.s32.totalorder %s1766_s22, %s1762_s21  ;;  %p35_p5 = scmp.ge.s32.totalorder %s2549_s7, 2 }
  0x11   : > { %p54_p6 = scmp.eq.s32.totalorder %s1403_s29, 0  ;;  %s148_s10 = ssub.s32 %s1782_s26, %s2547_s6 }
  0x12   : > { %s152_s11 = sadd.s32 1, %s1758_s20  ;;  %s2551_s7 = smov (%p35_p5, %s2549_s7), 0 }
  0x13   : > { %2526 = sst [smem:[#allocation11_spill]] %s2551_s7  ;;  %p1907_p7 = por %p54_p6, %p53_p4 }
  0x14   : > { %p162_p8 = scmp.ne.s32.totalorder %s1758_s20, %s1754_s19  ;;  %s37_s13 = ssub.s32 %s1786_s27, %s2551_s7 }
  0x15   : > { %p163_p9 = scmp.eq.s32.totalorder %s1403_s29, 3  ;;  %p38_p10 = scmp.eq.s32.totalorder %s37_s13, 0 }
  0x16   : > { %s149_s14 = sor.u32 %s148_s10, %s37_s13  ;;  %p168_p13 = scmp.ne.s32.totalorder %s1754_s19, %s1750_s18 }
  0x17   : > { %p150_p11 = scmp.eq.s32.totalorder %s149_s14, 0  ;;  %p1915_p12 = por %p163_p9, %p162_p8 }
  0x18   : > { %s1920_s16 = scalar_select %p38_p10, %s1770_s23, %s40_s8  }
  0x19   : > { %s1923_s17 = scalar_select %p150_p11, %s1758_s20, %s152_s11  }
  0x1a   : > { %2529 = sst [smem:[#allocation12_spill]] %s1920_s16  ;;  %p169_p0 = scmp.eq.s32.totalorder %s1404_s30, 3 }
  0x1b   : > { %2530 = sst [smem:[#allocation13_spill]] %s1923_s17  ;;  %p1536_p1 = scmp.lt.s32.totalorder %s1790_s28, 4 }
  0x1c   : > { %p1928_p2 = por %p169_p0, %p168_p13  ;;  %s201_s29 = sand.u32 1, %s1770_s23  }
  0x1d   : > { %s1407_s10 = sshll.u32 %s201_s29, 8  ;;  %s1499_s13 = sshll.u32 %s1786_s27, 8 }
  0x1e   : > { %s210_s6 = scalar_lea.hbm %s2512_s0, %s1499_s13  ;;  %s205_s8 = scalar_lea.vmem [#allocation2], %s1407_s10 }
  0x1f   : > { %s213_s26 = sshll.u32 %s205_s8, 4  ;;  %s211_s16 = sshll.u32 %s210_s6, 4  ;;  %s214_s26 = int_to_ptr.vmem [resolvable:$true] %s213_s26  ;;  %s212_s16 = int_to_ptr.hbm [resolvable:$true] %s211_s16 }
  0x20   : > { %p1529_p4 = pnand %p1536_p1, %p1897_p3  ;;  %p1410_p5 = scmp.ge.s32.totalorder %s1790_s28, 1 }
  0x21   : > { %s202_s30 = scalar_lea.sflag [#allocation3], %s201_s29  ;;  %s1792_s11 = smov 128  }
  0x22   : > { %s1793_s17 = smov 8   ;;  %p221_p6 = scmp.lt.s32.totalorder %s1790_s28, 5 }
  0x23   : > { %1531 = dma.hbm_to_vmem [thread:$0]  (!%p1529_p4), %s212_s16, 4096, %s214_s26, %s202_s30, %s1792_s11, %s1792_s11, %s1793_s17  }
  0x24   : > { %p222_p8 = pnand %p1410_p5, %p221_p6 }
  0x25   : > { %s227_s27 = sand.u32 (!%p222_p8), 1, %s1766_s22  }
  0x26   : > { %225 = sbr.rel (%p222_p8) target bundleno = 626 (0x272), region = 40  ;;  %s1411_s7 = sshll.u32 (!%p222_p8), %s227_s27, 8 }
  0x27   : > { %s228_s13 = scalar_lea.sflag (!%p222_p8), [#allocation3], %s227_s27  ;;  %s1942_s10 = scalar_lea.vmem (!%p222_p8), [#allocation2], %s1411_s7 }
  0x2b   : > { %1741 = dma.done.wait (%p1907_p7), %s228_s13, 4096  }
  0x2c   : > { %1743 = vsyncadd (%p1907_p7), %s228_s13, 4294963200  ;;  %s1949_s26 = sshll.u32 %s1774_s24, 3  ;;  %s1500_s9 = sshll.u32 %s1774_s24, 7  ;;  %v1502_v0 = vld [vmem:[%s2515_s3 + $0x8] sm:$0xff]  ;;  %v1501_v1 = vld [vmem:[%s2515_s3] sm:$0xff]  ;;  %vm304_vm0 = vcmask 261120  }
  0x2d   : > { %s1431_s6 = sadd.s32 4294967295, %s1949_s26  ;;  %s1954_s16 = scalar_lea.vmem %s1942_s10, %s1500_s9 [#allocation2]  ;;  %335 = vmatpush.bf16.msra.mxu0 %v1502_v0  ;;  %1514 = vmatpush.bf16.msra.mxu2 %v1502_v0  ;;  %vm600_vm2 = vcmask 1040384   ;;  %vm601_vm3 = vsmask.f32 256  ;;  %vm752_vm5 = vcmask 1046528   ;;  %vm923_vm8 = vcmask 64512  }
  0x2e   : > { %p379_p3 = scmp.gt.s32.totalorder %s1431_s6, 0  ;;  %v264_v2 = vld [vmem:[%s1954_s16] sm:$0xff]  ;;  %v265_v3 = vld [vmem:[%s1954_s16 + $0x8] sm:$0xff]  ;;  %v278_v4 = vld [vmem:[%s1954_s16 + $0x70] sm:$0xff]  ;;  %403 = vmatpush.bf16.msra.mxu1 %v1502_v0  ;;  %s2003_s30 = sadd.s32 8, %s1949_s26  ;;  %vm940_vm9 = vcmask 130048  }
  0x2f   : > { %v279_v5 = vld [vmem:[%s1954_s16 + $0x78] sm:$0xff]  ;;  %v1967_v8 = vpack.c.bf16 %v265_v3, %v264_v2  ;;  %v266_v11 = vld [vmem:[%s1954_s16 + $0x10] sm:$0xff]  ;;  %v268_v14 = vld [vmem:[%s1954_s16 + $0x20] sm:$0xff]  ;;  %p382_p7 = scmp.lt.s32.totalorder %s2003_s30, 15  ;;  %p428_p9 = scmp.gt.s32.totalorder %s1949_s26, 0  ;;  %vm957_vm10 = vcmask 195584  }
  0x30   : > { %s2553_s6 = smov (!%p379_p3, %s1431_s6), 0  ;;  %v1969_v9 = vpack.c.bf16 %v279_v5, %v278_v4  ;;  %v267_v12 = vld [vmem:[%s1954_s16 + $0x18] sm:$0xff]  ;;  %v269_v15 = vld [vmem:[%s1954_s16 + $0x28] sm:$0xff]  ;;  %v270_v17 = vld [vmem:[%s1954_s16 + $0x30] sm:$0xff]  ;;  %s1795_s26 = smov 16   ;;  %vm990_vm11 = vcmask 326656  }
  0x31   : > { %s1432_s27 = sshll.u32 %s2553_s6, 4  ;;  %336 = vmatpush.bf16.msra.mxu0 %v1501_v1  ;;  %1515 = vmatpush.bf16.msra.mxu2 %v1501_v1  ;;  %v1978_v13 = vpack.c.bf16 %v267_v12, %v266_v11  ;;  %v1984_v16 = vpack.c.bf16 %v269_v15, %v268_v14  ;;  %v271_v18 = vld [vmem:[%s1954_s16 + $0x38] sm:$0xff]  ;;  %v272_v20 = vld [vmem:[%s1954_s16 + $0x40] sm:$0xff]  ;;  %v273_v21 = vld [vmem:[%s1954_s16 + $0x48] sm:$0xff]  ;;  %s1796_s9 = smov 40   ;;  %vm1007_vm12 = vcmask 392192  }
  0x32   : > { %s385_s29 = scalar_lea.vmem %s1942_s10, %s1432_s27 [#allocation2]  ;;  %404 = vmatpush.bf16.msra.mxu1 %v1501_v1  ;;  %v1990_v19 = vpack.c.bf16 %v271_v18, %v270_v17  ;;  %v1996_v22 = vpack.c.bf16 %v273_v21, %v272_v20  ;;  %v274_v23 = vld [vmem:[%s1954_s16 + $0x50] sm:$0xff]  ;;  %v275_v24 = vld [vmem:[%s1954_s16 + $0x58] sm:$0xff]  ;;  %v276_v26 = vld [vmem:[%s1954_s16 + $0x60] sm:$0xff]  ;;  %vm623_vm6 = vsmask.f32 7424  ;;  %s1798_s27 = smov 32  }
  0x33   : > { %v386_v6 = vld [vmem:[%s385_s29] sm:$0xff]  ;;  %v387_v7 = vld [vmem:[%s385_s29 + $0x8] sm:$0xff]  ;;  %v2005_v25 = vpack.c.bf16 %v275_v24, %v274_v23  ;;  %s383_s11 = scalar_select %p382_p7, %s2003_s30, 15  ;;  %vm2020_vm4 = vmand %vm600_vm2, %vm601_vm3  ;;  %vm1041_vm13 = vcmask 523264   ;;  %vm1024_vm14 = vcmask 457728   ;;  %vm1058_vm15 = vcmask 588800  }
  0x34   : > { %v388_v10 = vpack.c.bf16 %v387_v7, %v386_v6  ;;  %1423 = vmatmul.msk.bf16.vlgmr.msra.gmra.mxu0 %vm304_vm0, %v1967_v8  ;;  %1430 = vmatmul.msk.bf16.vlgmr.msra.gmra.mxu2 %vm304_vm0, %v1969_v9  ;;  %v277_v27 = vld [vmem:[%s1954_s16 + $0x68] sm:$0xff]  ;;  %s429_s6 = scalar_select %p428_p9, 1, 0 }
  0x35   : > { %420 = vmatpush.bf16.msrb.mxu2 %v1502_v0  ;;  %s1433_s7 = sshll.u32 %s383_s11, 4  ;;  %v2014_v30 = vpack.c.bf16 %v277_v27, %v276_v26  ;;  %s1797_s16 = smov 48  }
  0x36   : > { %1434 = vmatmul.msk.bf16.vlgmr.msra.gmra.mxu1 %vm304_vm0, %v388_v10  ;;  %s390_s13 = scalar_lea.vmem %s1942_s10, %s1433_s7 [#allocation2]  ;;  %v430_v32 = vstv %s429_s6  ;;  %s1794_s10 = smov 24  }
  0x37   : > { %v391_v28 = vld [vmem:[%s390_s13] sm:$0xff]  ;;  %v392_v29 = vld [vmem:[%s390_s13 + $0x8] sm:$0xff]  ;;  %vm431_vm1 = vcmp.eq.s32.totalorder %v430_v32, 1  ;;  %s1799_s12 = smov 8   ;;  %s1800_s17 = smov 56  }
  0x38   : > { %v393_v31 = vpack.c.bf16 %v392_v29, %v391_v28  ;;  %s1801_s29 = smov 64   ;;  %p434_p10 = scmp.lt.s32.totalorder %s2003_s30, 16 }
  0x39   : > { %421 = vmatpush.bf16.msrb.mxu2 %v1501_v1 }
  0x3a   : > { %s435_s14 = scalar_select %p434_p10, 1, 0 }
  0x44   : > { %1424 = vmatmul.msk.bf16.gmra.mxu0 %vm304_vm0, %v1978_v13  ;;  %1435 = vmatmul.msk.bf16.vlgmr.msrb.gmra.mxu2 %vm304_vm0, %v393_v31 }
  0x54   : > { %1425 = vmatmul.msk.bf16.gmra.mxu0 %vm304_vm0, %v1984_v16 }
  0x64   : > { %1426 = vmatmul.msk.bf16.gmra.mxu0 %vm304_vm0, %v1990_v19 }
  0x74   : > { %1427 = vmatmul.msk.bf16.gmra.mxu0 %vm304_vm0, %v1996_v22 }
  0x84   : > { %1428 = vmatmul.msk.bf16.gmra.mxu0 %vm304_vm0, %v2005_v25 }
  0x94   : > { %1429 = vmatmul.msk.bf16.gmra.mxu0 %vm304_vm0, %v2014_v30 }
  0xb1   : > { %v338_v33 = vpop.f32.mrf.mxu0 }
  0xb2   : > { %v442_v36 = vpack.c.bf16 %v338_v33, %v338_v33 }
  0xb3   : > { %v406_v34 = vpop.f32.mrf.mxu1 }
  0xb4   : > { %v432_v35 = vsel %vm431_vm1, %v406_v34, 0.0  ;;  %v482_v42 = vunpack.c.l.b16 %v442_v36 }
  0xb5   : > { %v440_v38 = vpack.c.bf16 %v432_v35, %v432_v35 }
  0xb7   : > { %v373_v37 = vpop.f32.mrf.mxu2  ;;  %v480_v44 = vunpack.c.l.b16 %v440_v38 }
  0xb8   : > { %v456_v45 = vpack.c.bf16 %v373_v37, %v373_v37 }
  0xb9   : > { %v340_v39 = vpop.f32.mrf.mxu0 }
  0xba   : > { %v443_v40 = vpack.c.bf16 %v340_v39, %v340_v39  ;;  %v496_v51 = vunpack.c.l.b16 %v456_v45 }
  0xbb   : > { %v408_v41 = vpop.f32.mrf.mxu1 }
  0xbc   : > { %v433_v43 = vsel %vm431_vm1, %v408_v41, 0.0  ;;  %v483_v46 = vunpack.c.l.b16 %v443_v40 }
  0xbd   : > { %v441_v47 = vpack.c.bf16 %v433_v43, %v433_v43 }
  0xbe   : > { %v501_v48 = vpack.c.b16 %v483_v46, %v482_v42 }
  0xbf   : > { %v481_v49 = vunpack.c.l.b16 %v441_v47  ;;  %v375_v50 = vpop.f32.mrf.mxu2 }
  0xc0   : > { %v518_v52 = vshrl.u32 %v501_v48, 16  ;;  %v457_v54 = vpack.c.bf16 %v375_v50, %v375_v50  ;;  %v521_v58 = vshll.u32 %v501_v48, 16 }
  0xc1   : > { %v500_v53 = vpack.c.b16 %v481_v49, %v480_v44  ;;  %v343_v56 = vpop.f32.mrf.mxu0 }
  0xc2   : > { %v520_v57 = vrot.slane %v518_v52, 7  ;;  %v497_v60 = vunpack.c.l.b16 %v457_v54  ;;  %v444_v2 = vpack.c.bf16 %v343_v56, %v343_v56 }
  0xc3   : > { %v511_v59 = vshrl.u32 %v500_v53, 16  ;;  %v514_v61 = vshll.u32 %v500_v53, 16 }
  0xc4   : > { %v523_v62 = vor.u32 %v521_v58, %v520_v57  ;;  %v508_v0 = vpack.c.b16 %v497_v60, %v496_v51  ;;  %v614_v1 = vsel %vm2020_vm4, %v520_v57, 0  ;;  %v484_v12 = vunpack.c.l.b16 %v444_v2 }
  0xc5   : > { %v513_v63 = vrot.slane %v511_v59, 7  ;;  %v757_v10 = vrot.slane %v614_v1, 1  ;;  %v644_v34 = vshll.u32 %v614_v1, 16 }
  0xc6   : > { %v567_v4 = vshrl.u32 %v508_v0, 16  ;;  %v570_v5 = vshll.u32 %v508_v0, 16  ;;  %v2028_v6 = vsel %vm2020_vm4, 0, %v523_v62 }
  0xc7   : > { %v516_v3 = vor.u32 %v514_v61, %v513_v63  ;;  %794 = vrot.lane.b32.xlu1 %v2028_v6, %s1794_s10  ;;  %v756_v7 = vrot.slane %v2028_v6, 1  ;;  %v639_v21 = vshll.u32 %v2028_v6, 16  ;;  %v613_v24 = vsel %vm2020_vm4, %v513_v63, 0 }
  0xc8   : > { %v569_v11 = vrot.slane %v567_v4, 7  ;;  %v754_v32 = vrot.slane %v613_v24, 1  ;;  %v637_v33 = vshrl.u32 %v2028_v6, 16  ;;  %v632_v41 = vshll.u32 %v613_v24, 16 }
  0xc9   : > { %v758_v14 = vsel %vm752_vm5, %v756_v7, %v757_v10  ;;  %v345_v15 = vpop.f32.mrf.mxu0  ;;  %v2036_v17 = vsel %vm2020_vm4, 0, %v516_v3  ;;  %v641_v31 = vrot.slane %v639_v21, 1  ;;  %v646_v42 = vrot.slane %v644_v34, 1 }
  0xca   : > { %v572_v18 = vor.u32 %v570_v5, %v569_v11  ;;  %779 = vrot.lane.b32.xlu0 %v758_v14, %s1795_s26  ;;  %842 = vrot.lane.b32.xlu2 %v758_v14, %s1796_s9  ;;  %v445_v20 = vpack.c.bf16 %v345_v15, %v345_v15  ;;  %v753_v26 = vrot.slane %v2036_v17, 1  ;;  %v627_v27 = vshll.u32 %v2036_v17, 16 }
  0xcb   : > { %v642_v39 = vor.u32 %v641_v31, %v637_v33  ;;  %v625_v40 = vshrl.u32 %v2036_v17, 16  ;;  %v621_v45 = vsel %vm2020_vm4, %v569_v11, 0  ;;  %v634_v49 = vrot.slane %v632_v41, 1 }
  0xcc   : > { %v485_v23 = vunpack.c.l.b16 %v445_v20  ;;  %v611_v29 = vsel %vm2020_vm4, 0, %v572_v18  ;;  %v755_v35 = vsel %vm752_vm5, %v753_v26, %v754_v32  ;;  %v629_v36 = vrot.slane %v627_v27, 1 }
  0xcd   : > { %v813_v44 = vshll.u32 %v611_v29, 16  ;;  %v647_v48 = vsel %vm623_vm6, %v642_v39, %v646_v42  ;;  %v811_v51 = vshrl.u32 %v611_v29, 16  ;;  %v818_v53 = vshll.u32 %v621_v45, 16 }
  0xce   : > { %v502_v28 = vpack.c.b16 %v485_v23, %v484_v12  ;;  %v630_v43 = vor.u32 %v629_v36, %v625_v40  ;;  %v839_v61 = vrot.slane %v611_v29, 1  ;;  %v840_v62 = vrot.slane %v621_v45, 1 }
  0xcf   : > { %871 = vrot.lane.b32.xlu1 %v611_v29, %s1797_s16  ;;  %v815_v52 = vrot.slane %v813_v44, 1  ;;  %v820_v60 = vrot.slane %v818_v53, 1 }
  0xd0   : > { %v525_v38 = vshrl.u32 %v502_v28, 16  ;;  %v528_v47 = vshll.u32 %v502_v28, 16  ;;  %v635_v50 = vsel %vm623_vm6, %v630_v43, %v634_v49  ;;  %v2070_v4 = vsel %vm752_vm5, %v839_v61, %v840_v62 }
  0xd1   : > { %v348_v37 = vpop.f32.mrf.mxu0  ;;  %v816_v59 = vor.u32 %v815_v52, %v811_v51 }
  0xd2   : > { %777 = vrot.lane.b32.xlu0 %v755_v35, %s1795_s26  ;;  %808 = vrot.lane.b32.xlu2 %v611_v29, %s1794_s10  ;;  %v527_v46 = vrot.slane %v525_v38, 7  ;;  %v446_v57 = vpack.c.bf16 %v348_v37, %v348_v37 }
  0xd3   : > { %v821_v3 = vsel %vm623_vm6, %v816_v59, %v820_v60 }
  0xd4   : > { %v530_v56 = vor.u32 %v528_v47, %v527_v46  ;;  %v486_v63 = vunpack.c.l.b16 %v446_v57  ;;  %v615_v2 = vsel %vm2020_vm4, %v527_v46, 0 }
  0xd5   : > { %v760_v11 = vrot.slane %v615_v2, 1  ;;  %v656_v14 = vshll.u32 %v615_v2, 16 }
  0xd6   : > { %v2062_v0 = vsel %vm2020_vm4, 0, %v530_v56 }
  0xd7   : > { %822 = vrot.lane.b32.xlu1 %v647_v48, %s1798_s27  ;;  %v759_v10 = vrot.slane %v2062_v0, 1  ;;  %v651_v12 = vshll.u32 %v2062_v0, 16  ;;  %v649_v20 = vshrl.u32 %v2062_v0, 16  ;;  %v658_v28 = vrot.slane %v656_v14, 1 }
  0xd9   : > { %v350_v54 = vpop.f32.mrf.mxu0  ;;  %v761_v18 = vsel %vm752_vm5, %v759_v10, %v760_v11  ;;  %v653_v21 = vrot.slane %v651_v12, 1 }
  0xda   : > { %720 = vrot.lane.b32.xlu0 %v635_v50, %s1799_s12  ;;  %722 = vrot.lane.b32.xlu2 %v647_v48, %s1799_s12  ;;  %v447_v58 = vpack.c.bf16 %v350_v54, %v350_v54 }
  0xdb   : > { %v654_v27 = vor.u32 %v653_v21, %v649_v20 }
  0xdc   : > { %v487_v1 = vunpack.c.l.b16 %v447_v58 }
  0xdd   : > { %v659_v31 = vsel %vm623_vm6, %v654_v27, %v658_v28 }
  0xde   : > { %v503_v7 = vpack.c.b16 %v487_v1, %v486_v63 }
  0xdf   : > { %796 = vrot.lane.b32.xlu1 %v2062_v0, %s1794_s10 }
  0xe0   : > { %v532_v15 = vshrl.u32 %v503_v7, 16  ;;  %v535_v26 = vshll.u32 %v503_v7, 16 }
  0xe1   : > { %v353_v5 = vpop.f32.mrf.mxu0 }
  0xe2   : > { %899 = vrot.lane.b32.xlu0 %v821_v3, %s1800_s17  ;;  %919 = vrot.lane.b32.xlu2 %v2070_v4, %s1801_s29  ;;  %v534_v24 = vrot.slane %v532_v15, 7  ;;  %v448_v32 = vpack.c.bf16 %v353_v5, %v353_v5 }
  0xe4   : > { %v537_v29 = vor.u32 %v535_v26, %v534_v24  ;;  %v488_v36 = vunpack.c.l.b16 %v448_v32  ;;  %v616_v39 = vsel %vm2020_vm4, %v534_v24, 0 }
  0xe5   : > { %v668_v44 = vshll.u32 %v616_v39, 16  ;;  %v763_v47 = vrot.slane %v616_v39, 1 }
  0xe6   : > { %v2089_v35 = vsel %vm2020_vm4, 0, %v537_v29 }
  0xe7   : > { %907 = vrot.lane.b32.xlu1 %v761_v18, %s1801_s29  ;;  %v663_v38 = vshll.u32 %v2089_v35, 16  ;;  %v661_v42 = vshrl.u32 %v2089_v35, 16  ;;  %v762_v46 = vrot.slane %v2089_v35, 1  ;;  %v670_v53 = vrot.slane %v668_v44, 1 }
  0xe9   : > { %v355_v23 = vpop.f32.mrf.mxu0  ;;  %v665_v43 = vrot.slane %v663_v38, 1  ;;  %v764_v54 = vsel %vm752_vm5, %v762_v46, %v763_v47 }
  0xea   : > { %836 = vrot.lane.b32.xlu0 %v821_v3, %s1798_s27  ;;  %859 = vrot.lane.b32.xlu2 %v2062_v0, %s1797_s16  ;;  %v449_v33 = vpack.c.bf16 %v355_v23, %v355_v23 }
  0xeb   : > { %v666_v52 = vor.u32 %v665_v43, %v661_v42 }
  0xec   : > { %v489_v37 = vunpack.c.l.b16 %v449_v33 }
  0xed   : > { %v671_v59 = vsel %vm623_vm6, %v666_v52, %v670_v53 }
  0xee   : > { %v504_v40 = vpack.c.b16 %v489_v37, %v488_v36 }
  0xef   : > { %724 = vrot.lane.b32.xlu1 %v659_v31, %s1799_s12 }
  0xf0   : > { %v539_v49 = vshrl.u32 %v504_v40, 16  ;;  %v542_v57 = vshll.u32 %v504_v40, 16 }
  0xf1   : > { %v358_v34 = vpop.f32.mrf.mxu0 }
  0xf2   : > { %844 = vrot.lane.b32.xlu0 %v761_v18, %s1796_s9  ;;  %824 = vrot.lane.b32.xlu2 %v659_v31, %s1798_s27  ;;  %v450_v41 = vpack.c.bf16 %v358_v34, %v358_v34  ;;  %v541_v56 = vrot.slane %v539_v49, 7 }
  0xf4   : > { %v490_v50 = vunpack.c.l.b16 %v450_v41  ;;  %v544_v61 = vor.u32 %v542_v57, %v541_v56  ;;  %v617_v63 = vsel %vm2020_vm4, %v541_v56, 0  ;;  %v423_v56 = vpop.f32.mrf.mxu2 }
  0xf5   : > { %v766_v11 = vrot.slane %v617_v63, 1  ;;  %v680_v26 = vshll.u32 %v617_v63, 16 }
  0xf6   : > { %v2110_v1 = vsel %vm2020_vm4, 0, %v544_v61 }
  0xf7   : > { %861 = vrot.lane.b32.xlu1 %v2089_v35, %s1797_s16  ;;  %v765_v10 = vrot.slane %v2110_v1, 1  ;;  %v675_v14 = vshll.u32 %v2110_v1, 16  ;;  %v673_v23 = vshrl.u32 %v2110_v1, 16  ;;  %v682_v32 = vrot.slane %v680_v26, 1 }
  0xf9   : > { %v360_v45 = vpop.f32.mrf.mxu0  ;;  %v2118_v21 = vsel %vm752_vm5, %v765_v10, %v766_v11  ;;  %v677_v24 = vrot.slane %v675_v14, 1 }
  0xfa   : > { %781 = vrot.lane.b32.xlu0 %v761_v18, %s1795_s26  ;;  %798 = vrot.lane.b32.xlu2 %v2089_v35, %s1794_s10  ;;  %v451_v48 = vpack.c.bf16 %v360_v45, %v360_v45 }
  0xfc   : > { %v491_v51 = vunpack.c.l.b16 %v451_v48 }
  0xfe   : > { %v505_v58 = vpack.c.b16 %v491_v51, %v490_v50 }
  0xff   : > { %846 = vrot.lane.b32.xlu1 %v764_v54, %s1796_s9 }
 0x100   : > { %v546_v62 = vshrl.u32 %v505_v58, 16  ;;  %v549_v3 = vshll.u32 %v505_v58, 16 }
 0x101   : > { %v363_v60 = vpop.f32.mrf.mxu0 }
 0x102   : > { %887 = vrot.lane.b32.xlu0 %v659_v31, %s1800_s17  ;;  %889 = vrot.lane.b32.xlu2 %v671_v59, %s1800_s17  ;;  %v548_v2 = vrot.slane %v546_v62, 7  ;;  %v452_v5 = vpack.c.bf16 %v363_v60, %v363_v60  ;;  %v678_v31 = vor.u32 %v677_v24, %v673_v23  ;;  %v436_v62 = vstv %s435_s14 }
 0x103   : > { %vm437_vm7 = vcmp.eq.s32.totalorder %v436_v62, 1 }
 0x104   : > { %v551_v15 = vor.u32 %v549_v3, %v548_v2  ;;  %v492_v18 = vunpack.c.l.b16 %v452_v5  ;;  %v618_v34 = vsel %vm2020_vm4, %v548_v2, 0  ;;  %v2134_v37 = vsel %vm623_vm6, %v678_v31, %v682_v32 }
 0x105   : > { %v692_v40 = vshll.u32 %v618_v34, 16  ;;  %v769_v50 = vrot.slane %v618_v34, 1 }
 0x106   : > { %v2123_v27 = vsel %vm2020_vm4, 0, %v551_v15 }
 0x107   : > { %783 = vrot.lane.b32.xlu1 %v764_v54, %s1795_s26  ;;  %v687_v33 = vshll.u32 %v2123_v27, 16  ;;  %v685_v38 = vshrl.u32 %v2123_v27, 16  ;;  %v694_v46 = vrot.slane %v692_v40, 1  ;;  %v768_v49 = vrot.slane %v2123_v27, 1 }
 0x109   : > { %v365_v7 = vpop.f32.mrf.mxu0  ;;  %v689_v39 = vrot.slane %v687_v33, 1  ;;  %v2155_v57 = vsel %vm752_vm5, %v768_v49, %v769_v50  ;;  %v1511_v49 = vld [vmem:[%s2516_s4 + $0x30] sm:$0xff] }
 0x10a   : > { %909 = vrot.lane.b32.xlu0 %v764_v54, %s1801_s29  ;;  %726 = vrot.lane.b32.xlu2 %v671_v59, %s1799_s12  ;;  %v453_v12 = vpack.c.bf16 %v365_v7, %v365_v7  ;;  %v425_v7 = vpop.f32.mrf.mxu2 }
 0x10b   : > { %v690_v45 = vor.u32 %v689_v39, %v685_v38 }
 0x10c   : > { %v493_v20 = vunpack.c.l.b16 %v453_v12 }
 0x10d   : > { %v2146_v52 = vsel %vm623_vm6, %v690_v45, %v694_v46 }
 0x10e   : > { %v506_v28 = vpack.c.b16 %v493_v20, %v492_v18  ;;  %v438_v18 = vsel %vm437_vm7, %v423_v56, 0.0  ;;  %v439_v20 = vsel %vm437_vm7, %v425_v7, 0.0  ;;  %v1504_v56 = vld [vmem:[%s2513_s1 + $0x8] sm:$0xff]  ;;  %v1503_v7 = vld [vmem:[%s2513_s1] sm:$0xff] }
 0x10f   : > { %911 = vrot.lane.b32.xlu1 %v2118_v21, %s1801_s29  ;;  %v459_v31 = vpack.c.bf16 %v439_v20, %v439_v20  ;;  %1102 = vmatpush.bf16.msra.mxu3 %v1504_v56  ;;  %v1508_v20 = vld [vmem:[%s2516_s4 + $0x18] sm:$0xff] }
 0x110   : > { %v553_v36 = vshrl.u32 %v506_v28, 16  ;;  %v556_v42 = vshll.u32 %v506_v28, 16 }
 0x111   : > { %v368_v29 = vpop.f32.mrf.mxu0 }
 0x112   : > { %826 = vrot.lane.b32.xlu0 %v671_v59, %s1798_s27  ;;  %863 = vrot.lane.b32.xlu2 %v2110_v1, %s1797_s16  ;;  %v555_v41 = vrot.slane %v553_v36, 7  ;;  %v454_v44 = vpack.c.bf16 %v368_v29, %v368_v29  ;;  %v458_v29 = vpack.c.bf16 %v438_v18, %v438_v18  ;;  %v499_v36 = vunpack.c.l.b16 %v459_v31  ;;  %v1506_v31 = vld [vmem:[%s2516_s4 + $0x8] sm:$0xff] }
 0x113   : > { %1103 = vmatpush.bf16.msra.mxu3 %v1503_v7 }
 0x114   : > { %v558_v48 = vor.u32 %v556_v42, %v555_v41  ;;  %v494_v51 = vunpack.c.l.b16 %v454_v44  ;;  %v619_v60 = vsel %vm2020_vm4, %v555_v41, 0  ;;  %v498_v34 = vunpack.c.l.b16 %v458_v29  ;;  %v1512_v42 = vld [vmem:[%s2516_s4 + $0x38] sm:$0xff] }
 0x115   : > { %v704_v5 = vshll.u32 %v619_v60, 16  ;;  %v772_v24 = vrot.slane %v619_v60, 1  ;;  %1209 = vmatpush.bf16.msrb.mxu1 %v1512_v42  ;;  %1516 = vmatpush.bf16.msra.mxu2 %v1512_v42  ;;  %v1505_v42 = vld [vmem:[%s2516_s4] sm:$0xff] }
 0x116   : > { %v2150_v54 = vsel %vm2020_vm4, 0, %v558_v48  ;;  %v509_v41 = vpack.c.b16 %v499_v36, %v498_v34  ;;  %1444 = vmatmul.msk.bf16.vlgmr.msra.gmra.mxu3 %vm304_vm0, %v1967_v8 }
 0x117   : > { %828 = vrot.lane.b32.xlu1 %v2134_v37, %s1798_s27  ;;  %v699_v59 = vshll.u32 %v2150_v54, 16  ;;  %v697_v2 = vshrl.u32 %v2150_v54, 16  ;;  %v706_v14 = vrot.slane %v704_v5, 1  ;;  %v771_v23 = vrot.slane %v2150_v54, 1 }
 0x118   : > { %v574_v50 = vshrl.u32 %v509_v41, 16 }
 0x119   : > { %v370_v43 = vpop.f32.mrf.mxu0  ;;  %v701_v3 = vrot.slane %v699_v59, 1  ;;  %v2182_v32 = vsel %vm752_vm5, %v771_v23, %v772_v24  ;;  %1210 = vmatpush.bf16.msrb.mxu1 %v1511_v49  ;;  %1517 = vmatpush.bf16.msra.mxu2 %v1511_v49 }
 0x11a   : > { %800 = vrot.lane.b32.xlu0 %v2110_v1, %s1794_s10  ;;  %848 = vrot.lane.b32.xlu2 %v2118_v21, %s1796_s9  ;;  %v455_v47 = vpack.c.bf16 %v370_v43, %v370_v43  ;;  %v576_v62 = vrot.slane %v574_v50, 7 }
 0x11b   : > { %v702_v12 = vor.u32 %v701_v3, %v697_v2  ;;  %v1510_v2 = vld [vmem:[%s2516_s4 + $0x28] sm:$0xff] }
 0x11c   : > { %v495_v53 = vunpack.c.l.b16 %v455_v47 }
 0x11d   : > { %v2177_v28 = vsel %vm623_vm6, %v702_v12, %v706_v14  ;;  %1211 = vmatpush.bf16.msrb.mxu1 %v1510_v2  ;;  %1518 = vmatpush.bf16.msra.mxu2 %v1510_v2 }
 0x11e   : > { %v507_v58 = vpack.c.b16 %v495_v53, %v494_v51 }
 0x11f   : > { %730 = vrot.lane.b32.xlu1 %v2146_v52, %s1799_s12 }
 0x120   : > { %v560_v63 = vshrl.u32 %v507_v58, 16  ;;  %v563_v11 = vshll.u32 %v507_v58, 16 }
 0x122   : > { %891 = vrot.lane.b32.xlu0 %v2134_v37, %s1800_s17  ;;  %787 = vrot.lane.b32.xlu2 %v2155_v57, %s1795_s26  ;;  %v562_v10 = vrot.slane %v560_v63, 7  ;;  %v577_v63 = vshll.u32 %v509_v41, 16 }
 0x124   : > { %v2164_v61 = vpop.permute.xlu2 %842  ;;  %v565_v26 = vor.u32 %v563_v11, %v562_v10  ;;  %v620_v40 = vsel %vm2020_vm4, %v562_v10, 0  ;;  %v1509_v10 = vld [vmem:[%s2516_s4 + $0x20] sm:$0xff]  ;;  %v579_v11 = vor.u32 %v577_v63, %v576_v62 }
 0x125   : > { %v716_v46 = vshll.u32 %v620_v40, 16  ;;  %v775_v48 = vrot.slane %v620_v40, 1  ;;  %1212 = vmatpush.bf16.msrb.mxu1 %v1509_v10  ;;  %1519 = vmatpush.bf16.msra.mxu2 %v1509_v10 }
 0x126   : > { %v2186_v33 = vsel %vm2020_vm4, 0, %v565_v26  ;;  %v612_v18 = vsel %vm2020_vm4, 0, %v579_v11  ;;  %v622_v26 = vsel %vm2020_vm4, %v576_v62, 0  ;;  %1445 = vmatmul.msk.bf16.gmra.mxu3 %vm304_vm0, %v1978_v13 }
 0x127   : > { %893 = vrot.lane.b32.xlu1 %v2146_v52, %s1800_s17  ;;  %v711_v39 = vshll.u32 %v2186_v33, 16  ;;  %v709_v44 = vshrl.u32 %v2186_v33, 16  ;;  %v774_v47 = vrot.slane %v2186_v33, 1  ;;  %v718_v59 = vrot.slane %v716_v46, 1 }
 0x128   : > { %v878_v24 = vshll.u32 %v612_v18, 16  ;;  %v876_v34 = vshrl.u32 %v612_v18, 16  ;;  %v905_v46 = vrot.slane %v622_v26, 1 }
 0x129   : > { %v713_v45 = vrot.slane %v711_v39, 1  ;;  %v776_v60 = vsel %vm752_vm5, %v774_v47, %v775_v48  ;;  %1213 = vmatpush.bf16.msrb.mxu1 %v1508_v20  ;;  %1520 = vmatpush.bf16.msra.mxu2 %v1508_v20  ;;  %v883_v39 = vshll.u32 %v622_v26, 16 }
 0x12a   : > { %865 = vrot.lane.b32.xlu0 %v2123_v27, %s1797_s16  ;;  %913 = vrot.lane.b32.xlu2 %v2155_v57, %s1801_s29  ;;  %v880_v36 = vrot.slane %v878_v24, 1 }
 0x12b   : > { %v714_v58 = vor.u32 %v713_v45, %v709_v44  ;;  %v885_v41 = vrot.slane %v883_v39, 1  ;;  %v904_v45 = vrot.slane %v612_v18, 1 }
 0x12c   : > { %v2173_v15 = vpop.permute.xlu2 %808  ;;  %v881_v55 = vor.u32 %v880_v36, %v876_v34 }
 0x12d   : > { %v719_v5 = vsel %vm623_vm6, %v714_v58, %v718_v59  ;;  %v906_v49 = vsel %vm752_vm5, %v904_v45, %v905_v46 }
 0x12e   : > { %v886_v47 = vsel %vm623_vm6, %v881_v55, %v885_v41 }
 0x12f   : > { %832 = vrot.lane.b32.xlu1 %v2177_v28, %s1798_s27 }
 0x132   : > { %804 = vrot.lane.b32.xlu0 %v2150_v54, %s1794_s10  ;;  %852 = vrot.lane.b32.xlu2 %v2182_v32, %s1796_s9 }
 0x134   : > { %v2192_v38 = vpop.permute.xlu2 %722 }
 0x136   : > { %1446 = vmatmul.msk.bf16.gmra.mxu3 %vm304_vm0, %v1984_v16 }
 0x137   : > { %806 = vrot.lane.b32.xlu1 %v2186_v33, %s1794_s10 }
 0x139   : > { %v2202_v43 = vpop.permute.xlu1 %794 }
 0x13a   : > { %789 = vrot.lane.b32.xlu0 %v2182_v32, %s1795_s26  ;;  %732 = vrot.lane.b32.xlu2 %v2177_v28, %s1799_s12 }
 0x13c   : > { %v2213_v51 = vpop.permute.xlu0 %779  ;;  %v2215_v53 = vpop.permute.xlu2 %919 }
 0x13f   : > { %917 = vrot.lane.b32.xlu1 %v776_v60, %s1801_s29 }
 0x141   : > { %v2225_v3 = vpop.permute.xlu1 %871 }
 0x142   : > { %869 = vrot.lane.b32.xlu0 %v2186_v33, %s1797_s16  ;;  %897 = vrot.lane.b32.xlu2 %v719_v5, %s1800_s17 }
 0x144   : > { %v778_v12 = vpop.permute.xlu0 %777  ;;  %v2237_v14 = vpop.permute.xlu2 %859 }
 0x146   : > { %1447 = vmatmul.msk.bf16.gmra.mxu3 %vm304_vm0, %v1990_v19 }
 0x147   : > { %856 = vrot.lane.b32.xlu1 %v2070_v4, %s1796_s9  ;;  %v1507_v4 = vld [vmem:[%s2516_s4 + $0x10] sm:$0xff] }
 0x148   : > { %1214 = vmatpush.bf16.msrb.mxu1 %v1507_v4  ;;  %1521 = vmatpush.bf16.msra.mxu2 %v1507_v4 }
 0x149   : > { %v823_v23 = vpop.permute.xlu1 %822 }
 0x14a   : > { %854 = vrot.lane.b32.xlu0 %v776_v60, %s1796_s9  ;;  %834 = vrot.lane.b32.xlu2 %v719_v5, %s1798_s27 }
 0x14c   : > { %v721_v8 = vpop.permute.xlu0 %720  ;;  %v2255_v29 = vpop.permute.xlu2 %824  ;;  %1215 = vmatpush.bf16.msrb.mxu1 %v1506_v31  ;;  %1522 = vmatpush.bf16.msra.mxu2 %v1506_v31 }
 0x14d   : > { %v925_v59 = vsel %vm923_vm8, %v2036_v17, %v721_v8 }
 0x14f   : > { %791 = vrot.lane.b32.xlu1 %v776_v60, %s1795_s26 }
 0x150   : > { %1216 = vmatpush.bf16.msrb.mxu1 %v1505_v42  ;;  %1523 = vmatpush.bf16.msra.mxu2 %v1505_v42 }
 0x151   : > { %v797_v40 = vpop.permute.xlu1 %796 }
 0x152   : > { %728 = vrot.lane.b32.xlu0 %v2134_v37, %s1799_s12  ;;  %873 = vrot.lane.b32.xlu2 %v612_v18, %s1797_s16 }
 0x154   : > { %v2267_v44 = vpop.permute.xlu0 %899  ;;  %v2270_v48 = vpop.permute.xlu2 %798 }
 0x156   : > { %1448 = vmatmul.msk.bf16.gmra.mxu3 %vm304_vm0, %v1996_v22 }
 0x157   : > { %901 = vrot.lane.b32.xlu1 %v886_v47, %s1800_s17 }
 0x159   : > { %v908_v37 = vpop.permute.xlu1 %907 }
 0x15a   : > { %921 = vrot.lane.b32.xlu0 %v906_v49, %s1801_s29  ;;  %785 = vrot.lane.b32.xlu2 %v2118_v21, %s1795_s26  ;;  %v942_v21 = vsel %vm940_vm9, %v925_v59, %v778_v12 }
 0x15b   : > { %v959_v17 = vsel %vm957_vm10, %v942_v21, %v2202_v43 }
 0x15c   : > { %v2279_v50 = vpop.permute.xlu0 %836  ;;  %v890_v56 = vpop.permute.xlu2 %889  ;;  %v975_v63 = vsel %vm304_vm0, %v959_v17, %v823_v23 }
 0x15d   : > { %v992_v2 = vsel %vm990_vm11, %v975_v63, %v2164_v61 }
 0x15f   : > { %802 = vrot.lane.b32.xlu1 %v2123_v27, %s1794_s10 }
 0x161   : > { %v725_v58 = vpop.permute.xlu1 %724 }
 0x162   : > { %734 = vrot.lane.b32.xlu0 %v719_v5, %s1799_s12  ;;  %830 = vrot.lane.b32.xlu2 %v2146_v52, %s1798_s27 }
 0x164   : > { %v845_v13 = vpop.permute.xlu0 %844  ;;  %v727_v52 = vpop.permute.xlu2 %726 }
 0x165   : > { %v931_v42 = vsel %vm923_vm8, %v2089_v35, %v727_v52 }
 0x166   : > { %1449 = vmatmul.msk.bf16.gmra.mxu3 %vm304_vm0, %v2005_v25 }
 0x167   : > { %867 = vrot.lane.b32.xlu1 %v2150_v54, %s1797_s16 }
 0x169   : > { %v862_v60 = vpop.permute.xlu1 %861 }
 0x16a   : > { %850 = vrot.lane.b32.xlu0 %v2155_v57, %s1796_s9  ;;  %895 = vrot.lane.b32.xlu2 %v2177_v28, %s1800_s17  ;;  %v1009_v57 = vsel %vm1007_vm12, %v992_v2, %v2237_v14  ;;  %s256_s9 = sand.u32 1, %s1754_s19   ;;  %s1513_s17 = sshll.u32 %s1774_s24, 4 }
 0x16b   : > { %s1412_s16 = sshll.u32 %s256_s9, 7  ;;  %s1292_s13 = scalar_lea.sflag [#allocation4], %s256_s9 }
 0x16c   : > { %v782_v62 = vpop.permute.xlu0 %781  ;;  %v864_v43 = vpop.permute.xlu2 %863  ;;  %s2407_s27 = scalar_lea.vmem [#allocation5], %s1412_s16 }
 0x171   : > { %v847_v16 = vpop.permute.xlu1 %846 }
 0x172   : > { %915 = vrot.lane.b32.xlu0 %v2182_v32, %s1801_s29  ;;  %v927_v32 = vsel %vm923_vm8, %v2028_v6, %v2192_v38  ;;  %v929_v38 = vsel %vm923_vm8, %v2062_v0, %v725_v58  ;;  %s1495_s29 = sshll.u32 %s1778_s25, 5  ;;  %s1307_s25 = sshll.u32 %s2407_s27, 4  ;;  %s1308_s25 = int_to_ptr.vmem [resolvable:$true] %s1307_s25 }
 0x173   : > { %v944_v10 = vsel %vm940_vm9, %v927_v32, %v2213_v51  ;;  %v946_v8 = vsel %vm940_vm9, %v929_v38, %v782_v62  ;;  %s1304_s14 = sadd.s32 %s1513_s17, %s1495_s29  ;;  %s1688_s17 = scalar_lea.hbm %s2517_s5, 512 }
 0x174   : > { %v888_v28 = vpop.permute.xlu0 %887  ;;  %v961_v12 = vsel %vm957_vm10, %v944_v10, %v797_v40  ;;  %v849_v14 = vpop.permute.xlu2 %848  ;;  %v963_v31 = vsel %vm957_vm10, %v946_v8, %v2270_v48  ;;  %s1496_s8 = sshll.u32 %s1304_s14, 3 }
 0x175   : > { %v1026_v5 = vsel %vm1024_vm14, %v1009_v57, %v888_v28  ;;  %v977_v18 = vsel %vm304_vm0, %v961_v12, %v2255_v29  ;;  %s1306_s24 = scalar_lea.hbm %s2517_s5, %s1496_s8 }
 0x176   : > { %v1043_v7 = vsel %vm1041_vm13, %v1026_v5, %v908_v37  ;;  %v994_v20 = vsel %vm990_vm11, %v977_v18, %v845_v13  ;;  %1450 = vmatmul.msk.bf16.gmra.mxu3 %vm304_vm0, %v2014_v30  ;;  %s1309_s7 = sshll.u32 %s1306_s24, 4  ;;  %s1310_s7 = int_to_ptr.hbm [resolvable:$true] %s1309_s7 }
 0x177   : > { %1484 = vmatmul.msk.bf16.vlgmr.msrb.gmra.mxu1 %vm1058_vm15, %v1043_v7  ;;  %v1011_v19 = vsel %vm1007_vm12, %v994_v20, %v862_v60  ;;  %s1682_s6 = sshra.s32 %s1310_s7, 4  ;;  %s1683_s6 = int_to_ptr.hbm [resolvable:$true] %s1682_s6 }
 0x178   : > { %v1028_v4 = vsel %vm1024_vm14, %v1011_v19, %v890_v56  ;;  %s1684_s10 = scalar_lea.hbm %s1683_s6, 128  ;;  %p1689_p1 = scmp.lt.s32.totalorder %s1683_s6, %s2517_s5 }
 0x179   : > { %v784_v61 = vpop.permute.xlu1 %783  ;;  %p1685_p11 = scmp.ne.s32.totalorder %s1683_s6, %s1684_s10  ;;  %p1690_p4 = scmp.lt.s32.totalorder %s1688_s17, %s1684_s10 }
 0x17a   : > { %v948_v45 = vsel %vm940_vm9, %v931_v42, %v784_v61 }
 0x17b   : > { %p1686_p13 = pnand %p1685_p11, %p1915_p12  ;;  %p1691_p5 = por %p1690_p4, %p1689_p1 }
 0x17c   : > { %v910_v11 = vpop.permute.xlu0 %909  ;;  %v788_v51 = vpop.permute.xlu2 %787 }
 0x17d   : > { %v1045_v6 = vsel %vm1041_vm13, %v1028_v4, %v910_v11  ;;  %p1687_p0 = pneg %p1686_p13 }
 0x17f   : > { %p1692_p6 = pnand %p1691_p5, %p1687_p0 }
 0x181   : > { %v912_v23 = vpop.permute.xlu1 %911 }
 0x184   : > { %v827_v24 = vpop.permute.xlu0 %826  ;;  %v914_v40 = vpop.permute.xlu2 %913 }
 0x185   : > { %v979_v34 = vsel %vm304_vm0, %v963_v31, %v827_v24 }
 0x186   : > { %v996_v36 = vsel %vm990_vm11, %v979_v34, %v847_v16  ;;  %1451 = vmatmul.msk.bf16.gmra.mxu3 %vm304_vm0, %v1969_v9 }
 0x187   : > { %1485 = vmatmul.msk.bf16.gmra.mxu1 %vm1058_vm15, %v1045_v6  ;;  %v1013_v55 = vsel %vm1007_vm12, %v996_v36, %v864_v43 }
 0x189   : > { %v829_v26 = vpop.permute.xlu1 %828 }
 0x18c   : > { %v801_v29 = vpop.permute.xlu0 %800  ;;  %v853_v49 = vpop.permute.xlu2 %852 }
 0x18d   : > { %v965_v46 = vsel %vm957_vm10, %v948_v45, %v801_v29 }
 0x18e   : > { %v981_v48 = vsel %vm304_vm0, %v965_v46, %v829_v26 }
 0x18f   : > { %v998_v56 = vsel %vm990_vm11, %v981_v48, %v849_v14 }
 0x191   : > { %v731_v39 = vpop.permute.xlu1 %730 }
 0x192   : > { %v935_v17 = vsel %vm923_vm8, %v2123_v27, %v731_v39 }
 0x193   : > { %v952_v62 = vsel %vm940_vm9, %v935_v17, %v788_v51 }
 0x194   : > { %v892_v22 = vpop.permute.xlu0 %891  ;;  %v733_v25 = vpop.permute.xlu2 %732 }
 0x195   : > { %v1030_v41 = vsel %vm1024_vm14, %v1013_v55, %v892_v22  ;;  %v937_v30 = vsel %vm923_vm8, %v2150_v54, %v733_v25 }
 0x196   : > { %v1047_v0 = vsel %vm1041_vm13, %v1030_v41, %v912_v23 }
 0x197   : > { %1486 = vmatmul.msk.bf16.gmra.mxu1 %vm1058_vm15, %v1047_v0 }
 0x199   : > { %v894_v47 = vpop.permute.xlu1 %893  ;;  %v1105_v4 = vpop.f32.mrf.mxu3 }
 0x19c   : > { %v866_v37 = vpop.permute.xlu0 %865  ;;  %v898_v16 = vpop.permute.xlu2 %897 }
 0x19d   : > { %v1015_v58 = vsel %vm1007_vm12, %v998_v56, %v866_v37  ;;  %v2401_v56 = vld [vmem:[%s2514_s2] ss:$0 sm:$0xff] }
 0x19e   : > { %v1032_v35 = vsel %vm1024_vm14, %v1015_v58, %v894_v47  ;;  %v1106_v58 = vadd.f32 %v2401_v56, %v1105_v4 }
 0x19f   : > { %v1049_v21 = vsel %vm1041_vm13, %v1032_v35, %v914_v40 }
 0x1a1   : > { %v833_v13 = vpop.permute.xlu1 %832 }
 0x1a4   : > { %v805_v59 = vpop.permute.xlu0 %804  ;;  %v835_v11 = vpop.permute.xlu2 %834 }
 0x1a5   : > { %v969_v63 = vsel %vm957_vm10, %v952_v62, %v805_v59 }
 0x1a6   : > { %v985_v2 = vsel %vm304_vm0, %v969_v63, %v833_v13 }
 0x1a7   : > { %1487 = vmatmul.msk.bf16.gmra.mxu1 %vm1058_vm15, %v1049_v21  ;;  %v1002_v28 = vsel %vm990_vm11, %v985_v2, %v853_v49 }
 0x1a9   : > { %v807_v60 = vpop.permute.xlu1 %806 }
 0x1ac   : > { %v790_v52 = vpop.permute.xlu0 %789  ;;  %v874_v9 = vpop.permute.xlu2 %873 }
 0x1ad   : > { %v954_v27 = vsel %vm940_vm9, %v937_v30, %v790_v52 }
 0x1ae   : > { %v971_v10 = vsel %vm957_vm10, %v954_v27, %v807_v60 }
 0x1af   : > { %v987_v14 = vsel %vm304_vm0, %v971_v10, %v835_v11 }
 0x1b1   : > { %v918_v57 = vpop.permute.xlu1 %917 }
 0x1b4   : > { %v870_v43 = vpop.permute.xlu0 %869  ;;  %v786_v51 = vpop.permute.xlu2 %785 }
 0x1b5   : > { %v1019_v5 = vsel %vm1007_vm12, %v1002_v28, %v870_v43 }
 0x1b6   : > { %v1036_v7 = vsel %vm1024_vm14, %v1019_v5, %v898_v16 }
 0x1b7   : > { %v1053_v61 = vsel %vm1041_vm13, %v1036_v7, %v918_v57 }
 0x1b8   : > { %1489 = vmatmul.msk.bf16.vlgmr.msra.gmra.mxu2 %vm1058_vm15, %v1053_v61 }
 0x1b9   : > { %v857_v32 = vpop.permute.xlu1 %856 }
 0x1bc   : > { %v855_v12 = vpop.permute.xlu0 %854  ;;  %v831_v36 = vpop.permute.xlu2 %830 }
 0x1bd   : > { %v1004_v54 = vsel %vm990_vm11, %v987_v14, %v855_v12 }
 0x1be   : > { %v1021_v18 = vsel %vm1007_vm12, %v1004_v54, %v2225_v3  ;;  %v1107_v3 = vpop.f32.mrf.mxu3 }
 0x1bf   : > { %v1038_v19 = vsel %vm1024_vm14, %v1021_v18, %v2267_v44  ;;  %v1108_v21 = vadd.f32 %v2401_v56, %v1107_v3 }
 0x1c0   : > { %v1055_v24 = vsel %vm1041_vm13, %v1038_v19, %v2215_v53 }
 0x1c1   : > { %v792_v20 = vpop.permute.xlu1 %791 }
 0x1c4   : > { %v729_v23 = vpop.permute.xlu0 %728  ;;  %v896_v46 = vpop.permute.xlu2 %895 }
 0x1c5   : > { %v933_v29 = vsel %vm923_vm8, %v2110_v1, %v729_v23 }
 0x1c6   : > { %v950_v39 = vsel %vm940_vm9, %v933_v29, %v786_v51  ;;  %v1110_v0 = vpop.f32.mrf.mxu3 }
 0x1c7   : > { %v1111_v52 = vadd.f32 %v2401_v56, %v1110_v0 }
 0x1c8   : > { %1490 = vmatmul.msk.bf16.gmra.mxu2 %vm1058_vm15, %v1055_v24 }
 0x1c9   : > { %v902_v6 = vpop.permute.xlu1 %901 }
 0x1cc   : > { %v922_v38 = vpop.permute.xlu0 %921 }
 0x1ce   : > { %v1112_v49 = vpop.f32.mrf.mxu3 }
 0x1cf   : > { %v1113_v2 = vadd.f32 %v2401_v56, %v1112_v49 }
 0x1d1   : > { %v803_v31 = vpop.permute.xlu1 %802 }
 0x1d4   : > { %v735_v26 = vpop.permute.xlu0 %734 }
 0x1d5   : > { %v939_v8 = vsel %vm923_vm8, %v2186_v33, %v735_v26  ;;  %v967_v33 = vsel %vm957_vm10, %v950_v39, %v803_v31 }
 0x1d6   : > { %v956_v44 = vsel %vm940_vm9, %v939_v8, %v792_v20  ;;  %v1115_v13 = vpop.f32.mrf.mxu3 }
 0x1d7   : > { %v973_v53 = vsel %vm957_vm10, %v956_v44, %v2173_v15  ;;  %v983_v15 = vsel %vm304_vm0, %v967_v33, %v831_v36  ;;  %v1116_v43 = vadd.f32 %v2401_v56, %v1115_v13 }
 0x1d8   : > { %v989_v34 = vsel %vm304_vm0, %v973_v53, %v2279_v50  ;;  %vm1274_vm0 = vcmask 785408  }
 0x1d9   : > { %v1006_v40 = vsel %vm990_vm11, %v989_v34, %v857_v32  ;;  %v868_v42 = vpop.permute.xlu1 %867 }
 0x1da   : > { %v1023_v55 = vsel %vm1007_vm12, %v1006_v40, %v874_v9 }
 0x1db   : > { %v1040_v1 = vsel %vm1024_vm14, %v1023_v55, %v902_v6 }
 0x1dc   : > { %v851_v22 = vpop.permute.xlu0 %850  ;;  %v1057_v41 = vsel %vm1041_vm13, %v1040_v1, %v922_v38 }
 0x1dd   : > { %1491 = vmatmul.msk.bf16.gmra.mxu2 %vm1058_vm15, %v1057_v41  ;;  %v1000_v50 = vsel %vm990_vm11, %v983_v15, %v851_v22 }
 0x1de   : > { %v1017_v45 = vsel %vm1007_vm12, %v1000_v50, %v868_v42  ;;  %v1117_v17 = vpop.f32.mrf.mxu3 }
 0x1df   : > { %v1034_v48 = vsel %vm1024_vm14, %v1017_v45, %v896_v46  ;;  %v1118_v27 = vadd.f32 %v2401_v56, %v1117_v17 }
 0x1e4   : > { %v916_v47 = vpop.permute.xlu0 %915 }
 0x1e5   : > { %v1051_v37 = vsel %vm1041_vm13, %v1034_v48, %v916_v47 }
 0x1e6   : > { %1488 = vmatmul.msk.bf16.gmra.mxu1 %vm1058_vm15, %v1051_v37  ;;  %v1120_v16 = vpop.f32.mrf.mxu3 }
 0x1e7   : > { %v1121_v11 = vadd.f32 %v2401_v56, %v1120_v16 }
 0x1ee   : > { %v1122_v5 = vpop.f32.mrf.mxu3 }
 0x1ef   : > { %v1123_v18 = vadd.f32 %v2401_v56, %v1122_v5 }
 0x1f4   : > { %v1218_v35 = vpop.f32.mrf.mxu1 }
 0x1f5   : > { %v1258_v59 = vadd.f32 %v1218_v35, %v1106_v58 }
 0x1f6   : > { %v1125_v61 = vpop.f32.mrf.mxu3 }
 0x1f7   : > { %1275 = vst.msk [vmem:[%s2407_s27] sm:$0xff] %vm1274_vm0, %v1258_v59  ;;  %v1126_v1 = vadd.f32 %v2401_v56, %v1125_v61 }
 0x1fc   : > { %v1220_v25 = vpop.f32.mrf.mxu1 }
 0x1fd   : > { %v1259_v60 = vadd.f32 %v1220_v25, %v1108_v21 }
 0x1fe   : > { %v1127_v54 = vpop.f32.mrf.mxu3 }
 0x1ff   : > { %1276 = vst.msk [vmem:[%s2407_s27 + $0x8] sm:$0xff] %vm1274_vm0, %v1259_v60  ;;  %v1128_v45 = vadd.f32 %v2401_v56, %v1127_v54 }
 0x204   : > { %v1223_v62 = vpop.f32.mrf.mxu1 }
 0x205   : > { %v1260_v63 = vadd.f32 %v1223_v62, %v1111_v52 }
 0x206   : > { %v1130_v19 = vpop.f32.mrf.mxu3 }
 0x207   : > { %1277 = vst.msk [vmem:[%s2407_s27 + $0x10] sm:$0xff] %vm1274_vm0, %v1260_v63  ;;  %v1131_v9 = vadd.f32 %v2401_v56, %v1130_v19 }
 0x20c   : > { %v1225_v57 = vpop.f32.mrf.mxu1 }
 0x20d   : > { %v1261_v28 = vadd.f32 %v1225_v57, %v1113_v2 }
 0x20e   : > { %v1132_v24 = vpop.f32.mrf.mxu3 }
 0x20f   : > { %1278 = vst.msk [vmem:[%s2407_s27 + $0x18] sm:$0xff] %vm1274_vm0, %v1261_v28  ;;  %v1133_v38 = vadd.f32 %v2401_v56, %v1132_v24 }
 0x214   : > { %v1228_v30 = vpop.f32.mrf.mxu1 }
 0x215   : > { %v1262_v7 = vadd.f32 %v1228_v30, %v1116_v43 }
 0x216   : > { %v1135_v26 = vpop.f32.mrf.mxu3 }
 0x217   : > { %1279 = vst.msk [vmem:[%s2407_s27 + $0x20] sm:$0xff] %vm1274_vm0, %v1262_v7  ;;  %v1136_v3 = vadd.f32 %v2401_v56, %v1135_v26 }
 0x21c   : > { %v1230_v32 = vpop.f32.mrf.mxu1 }
 0x21d   : > { %v1263_v10 = vadd.f32 %v1230_v32, %v1118_v27 }
 0x21e   : > { %v1137_v44 = vpop.f32.mrf.mxu3 }
 0x21f   : > { %1280 = vst.msk [vmem:[%s2407_s27 + $0x28] sm:$0xff] %vm1274_vm0, %v1263_v10  ;;  %v1138_v53 = vadd.f32 %v2401_v56, %v1137_v44 }
 0x224   : > { %v1233_v12 = vpop.f32.mrf.mxu1 }
 0x225   : > { %v1264_v14 = vadd.f32 %v1233_v12, %v1121_v11 }
 0x226   : > { %v1140_v39 = vpop.f32.mrf.mxu3 }
 0x227   : > { %1281 = vst.msk [vmem:[%s2407_s27 + $0x30] sm:$0xff] %vm1274_vm0, %v1264_v14  ;;  %v1141_v40 = vadd.f32 %v2401_v56, %v1140_v39 }
 0x22c   : > { %v1235_v20 = vpop.f32.mrf.mxu1 }
 0x22d   : > { %v1265_v23 = vadd.f32 %v1235_v20, %v1123_v18 }
 0x22e   : > { %v1142_v41 = vpop.f32.mrf.mxu3 }
 0x22f   : > { %1282 = vst.msk [vmem:[%s2407_s27 + $0x38] sm:$0xff] %vm1274_vm0, %v1265_v23  ;;  %v1143_v50 = vadd.f32 %v2401_v56, %v1142_v41 }
 0x23b   : > { %v1243_v4 = vpop.f32.mrf.mxu2 }
 0x23c   : > { %v1268_v6 = vadd.f32 %v1243_v4, %v1131_v9 }
 0x23e   : > { %1285 = vst.msk [vmem:[%s2407_s27 + $0x50] sm:$0xff] %vm1274_vm0, %v1268_v6 }
 0x243   : > { %v1245_v51 = vpop.f32.mrf.mxu2 }
 0x244   : > { %v1269_v8 = vadd.f32 %v1245_v51, %v1133_v38 }
 0x246   : > { %1286 = vst.msk [vmem:[%s2407_s27 + $0x58] sm:$0xff] %vm1274_vm0, %v1269_v8 }
 0x24b   : > { %v1248_v29 = vpop.f32.mrf.mxu2 }
 0x24c   : > { %v1270_v31 = vadd.f32 %v1248_v29, %v1136_v3 }
 0x24e   : > { %1287 = vst.msk [vmem:[%s2407_s27 + $0x60] sm:$0xff] %vm1274_vm0, %v1270_v31 }
 0x253   : > { %v1250_v34 = vpop.f32.mrf.mxu2 }
 0x254   : > { %v1271_v36 = vadd.f32 %v1250_v34, %v1138_v53 }
 0x256   : > { %1288 = vst.msk [vmem:[%s2407_s27 + $0x68] sm:$0xff] %vm1274_vm0, %v1271_v36 }
 0x260   : > { %v1253_v33 = vpop.f32.mrf.mxu2 }
 0x261   : > { %v1272_v55 = vadd.f32 %v1253_v33, %v1141_v40 }
 0x263   : > { %1289 = vst.msk [vmem:[%s2407_s27 + $0x70] sm:$0xff] %vm1274_vm0, %v1272_v55  ;;  %v1238_v22 = vpop.f32.mrf.mxu1 }
 0x264   : > { %v1266_v15 = vadd.f32 %v1238_v22, %v1126_v1 }
 0x266   : > { %1283 = vst.msk [vmem:[%s2407_s27 + $0x40] sm:$0xff] %vm1274_vm0, %v1266_v15 }
 0x268   : > { %v1255_v0 = vpop.f32.mrf.mxu2 }
 0x269   : > { %v1273_v42 = vadd.f32 %v1255_v0, %v1143_v50 }
 0x26b   : > { %1290 = vst.msk [vmem:[%s2407_s27 + $0x78] sm:$0xff] %vm1274_vm0, %v1273_v42  ;;  %v1240_v46 = vpop.f32.mrf.mxu1 }
 0x26c   : > { %v1267_v47 = vadd.f32 %v1240_v46, %v1128_v45 }
 0x26e   : > { %1284 = vst.msk [vmem:[%s2407_s27 + $0x48] sm:$0xff] %vm1274_vm0, %v1267_v47 }
 0x26f   : > { %1695 = shalt.err (!%p1692_p6)
}
 0x270   : > { %s1802_s9 = smov 128  }
 0x271   : > { %1526 = dma.vmem_to_hbm [thread:$0]  (%p1915_p12), %s1308_s25, 2048, %s1310_s7, %s1292_s13, %s1802_s9, %s1802_s9, %s1799_s12  }
 0x272 PF: > { %p1537_p8 = scmp.ge.s32.totalorder %s1790_s28, 2  ;;  %s1324_s27 = sand.u32 1, %s1750_s18  }
 0x273   : > { %s1325_s8 = scalar_lea.sflag [#allocation4], %s1324_s27 }
 0x274   : > { %p1533_p3 = pnand %p1537_p8, %p1928_p2 }
 0x276   : > { %p1534_p7 = pneg %p1533_p3 }
 0x278   : > { %1745 = dma.done.wait (%p1534_p7), %s1325_s8, 2048  }
 0x279   : > { %1747 = vsyncadd (%p1534_p7), %s1325_s8, 4294965248  ;;  %s21_s28 = sadd.s32 1, %s1790_s28   ;;  %s2534_s15 = sld [smem:[#allocation13_spill]] }
 0x27a   : > { %p18_p9 = scmp.ge.s32.totalorder %s21_s28, 6   ;;  %s2535_s12 = sld [smem:[#allocation12_spill]] }
 0x27b   : > { %s2536_s24 = sld [smem:[#allocation8_spill]]  ;;  %s2540_s18 = smov %s1754_s19 }
 0x27c   : > { %s2537_s25 = sld [smem:[#allocation9_spill]]  ;;  %s2541_s19 = smov %s1758_s20 }
 0x27d   : > { %s2538_s26 = sld [smem:[#allocation10_spill]]  ;;  %s2543_s21 = smov %s1766_s22 }
 0x27e   : > { %s2539_s27 = sld [smem:[#allocation11_spill]]  ;;  %s2544_s22 = smov %s1770_s23 }
 0x27f   : > { %s2542_s20 = smov %s2534_s15  ;;  %20 = sbr.rel (!%p18_p9) target bundleno = 9 (0x9), region = 88 }
 0x280   : > { %s2545_s23 = smov %s2535_s12 }
 0x284   :  { %1331 = vsyncpa [#allocation3], 1 }
 0x285   :  { %1333 = vsyncpa [#allocation3 + $0x1], 1 }
 0x286   :  { %1334 = vsyncpa [#allocation4], 1 }
 0x287   :  { %1336 = vsyncpa [#allocation4 + $0x1], 1 }

// kernel: tpu_custom_call.1
= control target key start
LH: loop header
LB: loop body
LE: loop exit
PB: predicated region body
PF: predicated region fallthrough
CT: control target
= control target key end

     0   :  { %10 = vsyncpa [#allocation3], 0  ;;  %s2512_s0 = inlined_call_operand.hbm [shape: f32[2,16,16,32], index: 0, kind: input, shape index: {}]   ;;  %s2513_s1 = inlined_call_operand.vmem [shape: bf16[32,96], index: 1, kind: input, shape index: {}]   ;;  %s2514_s2 = inlined_call_operand.vmem [shape: f32[1,96], index: 2, kind: input, shape index: {}]   ;;  %s2515_s3 = inlined_call_operand.vmem [shape: bf16[32,8], index: 3, kind: input, shape index: {}]   ;;  %s2516_s4 = inlined_call_operand.vmem [shape: bf16[128,96], index: 4, kind: input, shape index: {}]   ;;  %s2517_s5 = inlined_call_operand.hbm [shape: f32[2,16,16,96], index: 5, kind: output, shape index: {}]  }
   0x1   :  { %12 = vsyncpa [#allocation3 + $0x1], 0 }
   0x2   :  { %13 = vsyncpa [#allocation4], 0 }
   0x3   :  { %15 = vsyncpa [#allocation4 + $0x1], 0  ;;  %s1833_s18 = smov 0   ;;  %s1835_s19 = smov 0  }
   0x4   :  { %s1837_s20 = smov 0   ;;  %s1839_s21 = smov 0  }
   0x5   :  { %s1841_s22 = smov 0   ;;  %s1843_s23 = smov 0  }
   0x6   :  { %s1845_s24 = smov 0   ;;  %s1847_s25 = smov 0  }
   0x7   :  { %s1849_s26 = smov 0   ;;  %s1851_s27 = smov 0  }
   0x8   :  { %s1853_s28 = smov 0  }
   0x9 LB: > { %2522 = sst [smem:[#allocation8_spill]] %s1782_s26  ;;  %s1403_s29 = sadd.s32 4294967295, %s1790_s28   ;;  %s1790_s28 = sphi %s1853_s28, %s21_s28   ;;  %s1786_s27 = sphi %s1851_s27, %s2539_s27   ;;  %s1782_s26 = sphi %s1849_s26, %s2538_s26   ;;  %s1778_s25 = sphi %s1847_s25, %s2537_s25   ;;  %s1774_s24 = sphi %s1845_s24, %s2536_s24   ;;  %s1770_s23 = sphi %s1843_s23, %s2545_s23   ;;  %s1766_s22 = sphi %s1841_s22, %s2544_s22   ;;  %s1762_s21 = sphi %s1839_s21, %s2543_s21   ;;  %s1758_s20 = sphi %s1837_s20, %s2542_s20   ;;  %s1754_s19 = sphi %s1835_s19, %s2541_s19   ;;  %s1750_s18 = sphi %s1833_s18, %s2540_s18  }
   0xa   : > { %2523 = sst [smem:[#allocation9_spill]] %s1786_s27  ;;  %s1404_s30 = sadd.s32 4294967294, %s1790_s28  }
   0xb   : > { %s30_s6 = sadd.s32 1, %s1782_s26  ;;  %s33_s7 = sadd.s32 1, %s1786_s27 }
   0xc   : > { %p31_p0 = scmp.ge.s32.totalorder %s30_s6, 2  ;;  %s40_s8 = sadd.s32 1, %s1770_s23 }
   0xd   : > { %p47_p1 = scmp.ne.s32.totalorder %s1770_s23, %s1766_s22  ;;  %p48_p2 = scmp.eq.s32.totalorder %s1790_s28, 0 }
   0xe   : > { %s2547_s6 = smov (%p31_p0, %s30_s6), 0  ;;  %s2549_s7 = smov (!%p31_p0, %s33_s7), %s1786_s27 }
   0xf   : > { %2524 = sst [smem:[#allocation10_spill]] %s2547_s6  ;;  %p1897_p3 = por %p48_p2, %p47_p1 }
  0x10   : > { %p53_p4 = scmp.ne.s32.totalorder %s1766_s22, %s1762_s21  ;;  %p35_p5 = scmp.ge.s32.totalorder %s2549_s7, 2 }
  0x11   : > { %p54_p6 = scmp.eq.s32.totalorder %s1403_s29, 0  ;;  %s148_s10 = ssub.s32 %s1782_s26, %s2547_s6 }
  0x12   : > { %s152_s11 = sadd.s32 1, %s1758_s20  ;;  %s2551_s7 = smov (%p35_p5, %s2549_s7), 0 }
  0x13   : > { %2526 = sst [smem:[#allocation11_spill]] %s2551_s7  ;;  %p1907_p7 = por %p54_p6, %p53_p4 }
  0x14   : > { %p162_p8 = scmp.ne.s32.totalorder %s1758_s20, %s1754_s19  ;;  %s37_s13 = ssub.s32 %s1786_s27, %s2551_s7 }
  0x15   : > { %p163_p9 = scmp.eq.s32.totalorder %s1403_s29, 3  ;;  %p38_p10 = scmp.eq.s32.totalorder %s37_s13, 0 }
  0x16   : > { %s149_s14 = sor.u32 %s148_s10, %s37_s13  ;;  %p168_p13 = scmp.ne.s32.totalorder %s1754_s19, %s1750_s18 }
  0x17   : > { %p150_p11 = scmp.eq.s32.totalorder %s149_s14, 0  ;;  %p1915_p12 = por %p163_p9, %p162_p8 }
  0x18   : > { %s1920_s16 = scalar_select %p38_p10, %s1770_s23, %s40_s8  }
  0x19   : > { %s1923_s17 = scalar_select %p150_p11, %s1758_s20, %s152_s11  }
  0x1a   : > { %2529 = sst [smem:[#allocation12_spill]] %s1920_s16  ;;  %p169_p0 = scmp.eq.s32.totalorder %s1404_s30, 3 }
  0x1b   : > { %2530 = sst [smem:[#allocation13_spill]] %s1923_s17  ;;  %p1536_p1 = scmp.lt.s32.totalorder %s1790_s28, 4 }
  0x1c   : > { %p1928_p2 = por %p169_p0, %p168_p13  ;;  %s201_s29 = sand.u32 1, %s1770_s23  }
  0x1d   : > { %s1407_s10 = sshll.u32 %s201_s29, 8  ;;  %s1499_s13 = sshll.u32 %s1786_s27, 8 }
  0x1e   : > { %s210_s6 = scalar_lea.hbm %s2512_s0, %s1499_s13  ;;  %s205_s8 = scalar_lea.vmem [#allocation2], %s1407_s10 }
  0x1f   : > { %s213_s26 = sshll.u32 %s205_s8, 4  ;;  %s211_s16 = sshll.u32 %s210_s6, 4  ;;  %s214_s26 = int_to_ptr.vmem [resolvable:$true] %s213_s26  ;;  %s212_s16 = int_to_ptr.hbm [resolvable:$true] %s211_s16 }
  0x20   : > { %p1529_p4 = pnand %p1536_p1, %p1897_p3  ;;  %p1410_p5 = scmp.ge.s32.totalorder %s1790_s28, 1 }
  0x21   : > { %s202_s30 = scalar_lea.sflag [#allocation3], %s201_s29  ;;  %s1792_s11 = smov 128  }
  0x22   : > { %s1793_s17 = smov 8   ;;  %p221_p6 = scmp.lt.s32.totalorder %s1790_s28, 5 }
  0x23   : > { %1531 = dma.hbm_to_vmem [thread:$0]  (!%p1529_p4), %s212_s16, 4096, %s214_s26, %s202_s30, %s1792_s11, %s1792_s11, %s1793_s17  }
  0x24   : > { %p222_p8 = pnand %p1410_p5, %p221_p6 }
  0x25   : > { %s227_s27 = sand.u32 (!%p222_p8), 1, %s1766_s22  }
  0x26   : > { %225 = sbr.rel (%p222_p8) target bundleno = 626 (0x272), region = 40  ;;  %s1411_s7 = sshll.u32 (!%p222_p8), %s227_s27, 8 }
  0x27   : > { %s228_s13 = scalar_lea.sflag (!%p222_p8), [#allocation3], %s227_s27  ;;  %s1942_s10 = scalar_lea.vmem (!%p222_p8), [#allocation2], %s1411_s7 }
  0x2b   : > { %1741 = dma.done.wait (%p1907_p7), %s228_s13, 4096  }
  0x2c   : > { %1743 = vsyncadd (%p1907_p7), %s228_s13, 4294963200  ;;  %s1949_s26 = sshll.u32 %s1774_s24, 3  ;;  %s1500_s9 = sshll.u32 %s1774_s24, 7  ;;  %v1502_v0 = vld [vmem:[%s2515_s3 + $0x8] sm:$0xff]  ;;  %v1501_v1 = vld [vmem:[%s2515_s3] sm:$0xff]  ;;  %vm304_vm0 = vcmask 261120  }
  0x2d   : > { %s1431_s6 = sadd.s32 4294967295, %s1949_s26  ;;  %s1954_s16 = scalar_lea.vmem %s1942_s10, %s1500_s9 [#allocation2]  ;;  %335 = vmatpush.bf16.msra.mxu0 %v1502_v0  ;;  %1514 = vmatpush.bf16.msra.mxu2 %v1502_v0  ;;  %vm600_vm2 = vcmask 1040384   ;;  %vm601_vm3 = vsmask.f32 256  ;;  %vm752_vm5 = vcmask 1046528   ;;  %vm923_vm8 = vcmask 64512  }
  0x2e   : > { %p379_p3 = scmp.gt.s32.totalorder %s1431_s6, 0  ;;  %v264_v2 = vld [vmem:[%s1954_s16] sm:$0xff]  ;;  %v265_v3 = vld [vmem:[%s1954_s16 + $0x8] sm:$0xff]  ;;  %v278_v4 = vld [vmem:[%s1954_s16 + $0x70] sm:$0xff]  ;;  %403 = vmatpush.bf16.msra.mxu1 %v1502_v0  ;;  %s2003_s30 = sadd.s32 8, %s1949_s26  ;;  %vm940_vm9 = vcmask 130048  }
  0x2f   : > { %v279_v5 = vld [vmem:[%s1954_s16 + $0x78] sm:$0xff]  ;;  %v1967_v8 = vpack.c.bf16 %v265_v3, %v264_v2  ;;  %v266_v11 = vld [vmem:[%s1954_s16 + $0x10] sm:$0xff]  ;;  %v268_v14 = vld [vmem:[%s1954_s16 + $0x20] sm:$0xff]  ;;  %p382_p7 = scmp.lt.s32.totalorder %s2003_s30, 15  ;;  %p428_p9 = scmp.gt.s32.totalorder %s1949_s26, 0  ;;  %vm957_vm10 = vcmask 195584  }
  0x30   : > { %s2553_s6 = smov (!%p379_p3, %s1431_s6), 0  ;;  %v1969_v9 = vpack.c.bf16 %v279_v5, %v278_v4  ;;  %v267_v12 = vld [vmem:[%s1954_s16 + $0x18] sm:$0xff]  ;;  %v269_v15 = vld [vmem:[%s1954_s16 + $0x28] sm:$0xff]  ;;  %v270_v17 = vld [vmem:[%s1954_s16 + $0x30] sm:$0xff]  ;;  %s1795_s26 = smov 16   ;;  %vm990_vm11 = vcmask 326656  }
  0x31   : > { %s1432_s27 = sshll.u32 %s2553_s6, 4  ;;  %336 = vmatpush.bf16.msra.mxu0 %v1501_v1  ;;  %1515 = vmatpush.bf16.msra.mxu2 %v1501_v1  ;;  %v1978_v13 = vpack.c.bf16 %v267_v12, %v266_v11  ;;  %v1984_v16 = vpack.c.bf16 %v269_v15, %v268_v14  ;;  %v271_v18 = vld [vmem:[%s1954_s16 + $0x38] sm:$0xff]  ;;  %v272_v20 = vld [vmem:[%s1954_s16 + $0x40] sm:$0xff]  ;;  %v273_v21 = vld [vmem:[%s1954_s16 + $0x48] sm:$0xff]  ;;  %s1796_s9 = smov 40   ;;  %vm1007_vm12 = vcmask 392192  }
  0x32   : > { %s385_s29 = scalar_lea.vmem %s1942_s10, %s1432_s27 [#allocation2]  ;;  %404 = vmatpush.bf16.msra.mxu1 %v1501_v1  ;;  %v1990_v19 = vpack.c.bf16 %v271_v18, %v270_v17  ;;  %v1996_v22 = vpack.c.bf16 %v273_v21, %v272_v20  ;;  %v274_v23 = vld [vmem:[%s1954_s16 + $0x50] sm:$0xff]  ;;  %v275_v24 = vld [vmem:[%s1954_s16 + $0x58] sm:$0xff]  ;;  %v276_v26 = vld [vmem:[%s1954_s16 + $0x60] sm:$0xff]  ;;  %vm623_vm6 = vsmask.f32 7424  ;;  %s1798_s27 = smov 32  }
  0x33   : > { %v386_v6 = vld [vmem:[%s385_s29] sm:$0xff]  ;;  %v387_v7 = vld [vmem:[%s385_s29 + $0x8] sm:$0xff]  ;;  %v2005_v25 = vpack.c.bf16 %v275_v24, %v274_v23  ;;  %s383_s11 = scalar_select %p382_p7, %s2003_s30, 15  ;;  %vm2020_vm4 = vmand %vm600_vm2, %vm601_vm3  ;;  %vm1041_vm13 = vcmask 523264   ;;  %vm1024_vm14 = vcmask 457728   ;;  %vm1058_vm15 = vcmask 588800  }
  0x34   : > { %v388_v10 = vpack.c.bf16 %v387_v7, %v386_v6  ;;  %1423 = vmatmul.msk.bf16.vlgmr.msra.gmra.mxu0 %vm304_vm0, %v1967_v8  ;;  %1430 = vmatmul.msk.bf16.vlgmr.msra.gmra.mxu2 %vm304_vm0, %v1969_v9  ;;  %v277_v27 = vld [vmem:[%s1954_s16 + $0x68] sm:$0xff]  ;;  %s429_s6 = scalar_select %p428_p9, 1, 0 }
  0x35   : > { %420 = vmatpush.bf16.msrb.mxu2 %v1502_v0  ;;  %s1433_s7 = sshll.u32 %s383_s11, 4  ;;  %v2014_v30 = vpack.c.bf16 %v277_v27, %v276_v26  ;;  %s1797_s16 = smov 48  }
  0x36   : > { %1434 = vmatmul.msk.bf16.vlgmr.msra.gmra.mxu1 %vm304_vm0, %v388_v10  ;;  %s390_s13 = scalar_lea.vmem %s1942_s10, %s1433_s7 [#allocation2]  ;;  %v430_v32 = vstv %s429_s6  ;;  %s1794_s10 = smov 24  }
  0x37   : > { %v391_v28 = vld [vmem:[%s390_s13] sm:$0xff]  ;;  %v392_v29 = vld [vmem:[%s390_s13 + $0x8] sm:$0xff]  ;;  %vm431_vm1 = vcmp.eq.s32.totalorder %v430_v32, 1  ;;  %s1799_s12 = smov 8   ;;  %s1800_s17 = smov 56  }
  0x38   : > { %v393_v31 = vpack.c.bf16 %v392_v29, %v391_v28  ;;  %s1801_s29 = smov 64   ;;  %p434_p10 = scmp.lt.s32.totalorder %s2003_s30, 16 }
  0x39   : > { %421 = vmatpush.bf16.msrb.mxu2 %v1501_v1 }
  0x3a   : > { %s435_s14 = scalar_select %p434_p10, 1, 0 }
  0x44   : > { %1424 = vmatmul.msk.bf16.gmra.mxu0 %vm304_vm0, %v1978_v13  ;;  %1435 = vmatmul.msk.bf16.vlgmr.msrb.gmra.mxu2 %vm304_vm0, %v393_v31 }
  0x54   : > { %1425 = vmatmul.msk.bf16.gmra.mxu0 %vm304_vm0, %v1984_v16 }
  0x64   : > { %1426 = vmatmul.msk.bf16.gmra.mxu0 %vm304_vm0, %v1990_v19 }
  0x74   : > { %1427 = vmatmul.msk.bf16.gmra.mxu0 %vm304_vm0, %v1996_v22 }
  0x84   : > { %1428 = vmatmul.msk.bf16.gmra.mxu0 %vm304_vm0, %v2005_v25 }
  0x94   : > { %1429 = vmatmul.msk.bf16.gmra.mxu0 %vm304_vm0, %v2014_v30 }
  0xb1   : > { %v338_v33 = vpop.f32.mrf.mxu0 }
  0xb2   : > { %v442_v36 = vpack.c.bf16 %v338_v33, %v338_v33 }
  0xb3   : > { %v406_v34 = vpop.f32.mrf.mxu1 }
  0xb4   : > { %v432_v35 = vsel %vm431_vm1, %v406_v34, 0.0  ;;  %v482_v42 = vunpack.c.l.b16 %v442_v36 }
  0xb5   : > { %v440_v38 = vpack.c.bf16 %v432_v35, %v432_v35 }
  0xb7   : > { %v373_v37 = vpop.f32.mrf.mxu2  ;;  %v480_v44 = vunpack.c.l.b16 %v440_v38 }
  0xb8   : > { %v456_v45 = vpack.c.bf16 %v373_v37, %v373_v37 }
  0xb9   : > { %v340_v39 = vpop.f32.mrf.mxu0 }
  0xba   : > { %v443_v40 = vpack.c.bf16 %v340_v39, %v340_v39  ;;  %v496_v51 = vunpack.c.l.b16 %v456_v45 }
  0xbb   : > { %v408_v41 = vpop.f32.mrf.mxu1 }
  0xbc   : > { %v433_v43 = vsel %vm431_vm1, %v408_v41, 0.0  ;;  %v483_v46 = vunpack.c.l.b16 %v443_v40 }
  0xbd   : > { %v441_v47 = vpack.c.bf16 %v433_v43, %v433_v43 }
  0xbe   : > { %v501_v48 = vpack.c.b16 %v483_v46, %v482_v42 }
  0xbf   : > { %v481_v49 = vunpack.c.l.b16 %v441_v47  ;;  %v375_v50 = vpop.f32.mrf.mxu2 }
  0xc0   : > { %v518_v52 = vshrl.u32 %v501_v48, 16  ;;  %v457_v54 = vpack.c.bf16 %v375_v50, %v375_v50  ;;  %v521_v58 = vshll.u32 %v501_v48, 16 }
  0xc1   : > { %v500_v53 = vpack.c.b16 %v481_v49, %v480_v44  ;;  %v343_v56 = vpop.f32.mrf.mxu0 }
  0xc2   : > { %v520_v57 = vrot.slane %v518_v52, 7  ;;  %v497_v60 = vunpack.c.l.b16 %v457_v54  ;;  %v444_v2 = vpack.c.bf16 %v343_v56, %v343_v56 }
  0xc3   : > { %v511_v59 = vshrl.u32 %v500_v53, 16  ;;  %v514_v61 = vshll.u32 %v500_v53, 16 }
  0xc4   : > { %v523_v62 = vor.u32 %v521_v58, %v520_v57  ;;  %v508_v0 = vpack.c.b16 %v497_v60, %v496_v51  ;;  %v614_v1 = vsel %vm2020_vm4, %v520_v57, 0  ;;  %v484_v12 = vunpack.c.l.b16 %v444_v2 }
  0xc5   : > { %v513_v63 = vrot.slane %v511_v59, 7  ;;  %v757_v10 = vrot.slane %v614_v1, 1  ;;  %v644_v34 = vshll.u32 %v614_v1, 16 }
  0xc6   : > { %v567_v4 = vshrl.u32 %v508_v0, 16  ;;  %v570_v5 = vshll.u32 %v508_v0, 16  ;;  %v2028_v6 = vsel %vm2020_vm4, 0, %v523_v62 }
  0xc7   : > { %v516_v3 = vor.u32 %v514_v61, %v513_v63  ;;  %794 = vrot.lane.b32.xlu1 %v2028_v6, %s1794_s10  ;;  %v756_v7 = vrot.slane %v2028_v6, 1  ;;  %v639_v21 = vshll.u32 %v2028_v6, 16  ;;  %v613_v24 = vsel %vm2020_vm4, %v513_v63, 0 }
  0xc8   : > { %v569_v11 = vrot.slane %v567_v4, 7  ;;  %v754_v32 = vrot.slane %v613_v24, 1  ;;  %v637_v33 = vshrl.u32 %v2028_v6, 16  ;;  %v632_v41 = vshll.u32 %v613_v24, 16 }
  0xc9   : > { %v758_v14 = vsel %vm752_vm5, %v756_v7, %v757_v10  ;;  %v345_v15 = vpop.f32.mrf.mxu0  ;;  %v2036_v17 = vsel %vm2020_vm4, 0, %v516_v3  ;;  %v641_v31 = vrot.slane %v639_v21, 1  ;;  %v646_v42 = vrot.slane %v644_v34, 1 }
  0xca   : > { %v572_v18 = vor.u32 %v570_v5, %v569_v11  ;;  %779 = vrot.lane.b32.xlu0 %v758_v14, %s1795_s26  ;;  %842 = vrot.lane.b32.xlu2 %v758_v14, %s1796_s9  ;;  %v445_v20 = vpack.c.bf16 %v345_v15, %v345_v15  ;;  %v753_v26 = vrot.slane %v2036_v17, 1  ;;  %v627_v27 = vshll.u32 %v2036_v17, 16 }
  0xcb   : > { %v642_v39 = vor.u32 %v641_v31, %v637_v33  ;;  %v625_v40 = vshrl.u32 %v2036_v17, 16  ;;  %v621_v45 = vsel %vm2020_vm4, %v569_v11, 0  ;;  %v634_v49 = vrot.slane %v632_v41, 1 }
  0xcc   : > { %v485_v23 = vunpack.c.l.b16 %v445_v20  ;;  %v611_v29 = vsel %vm2020_vm4, 0, %v572_v18  ;;  %v755_v35 = vsel %vm752_vm5, %v753_v26, %v754_v32  ;;  %v629_v36 = vrot.slane %v627_v27, 1 }
  0xcd   : > { %v813_v44 = vshll.u32 %v611_v29, 16  ;;  %v647_v48 = vsel %vm623_vm6, %v642_v39, %v646_v42  ;;  %v811_v51 = vshrl.u32 %v611_v29, 16  ;;  %v818_v53 = vshll.u32 %v621_v45, 16 }
  0xce   : > { %v502_v28 = vpack.c.b16 %v485_v23, %v484_v12  ;;  %v630_v43 = vor.u32 %v629_v36, %v625_v40  ;;  %v839_v61 = vrot.slane %v611_v29, 1  ;;  %v840_v62 = vrot.slane %v621_v45, 1 }
  0xcf   : > { %871 = vrot.lane.b32.xlu1 %v611_v29, %s1797_s16  ;;  %v815_v52 = vrot.slane %v813_v44, 1  ;;  %v820_v60 = vrot.slane %v818_v53, 1 }
  0xd0   : > { %v525_v38 = vshrl.u32 %v502_v28, 16  ;;  %v528_v47 = vshll.u32 %v502_v28, 16  ;;  %v635_v50 = vsel %vm623_vm6, %v630_v43, %v634_v49  ;;  %v2070_v4 = vsel %vm752_vm5, %v839_v61, %v840_v62 }
  0xd1   : > { %v348_v37 = vpop.f32.mrf.mxu0  ;;  %v816_v59 = vor.u32 %v815_v52, %v811_v51 }
  0xd2   : > { %777 = vrot.lane.b32.xlu0 %v755_v35, %s1795_s26  ;;  %808 = vrot.lane.b32.xlu2 %v611_v29, %s1794_s10  ;;  %v527_v46 = vrot.slane %v525_v38, 7  ;;  %v446_v57 = vpack.c.bf16 %v348_v37, %v348_v37 }
  0xd3   : > { %v821_v3 = vsel %vm623_vm6, %v816_v59, %v820_v60 }
  0xd4   : > { %v530_v56 = vor.u32 %v528_v47, %v527_v46  ;;  %v486_v63 = vunpack.c.l.b16 %v446_v57  ;;  %v615_v2 = vsel %vm2020_vm4, %v527_v46, 0 }
  0xd5   : > { %v760_v11 = vrot.slane %v615_v2, 1  ;;  %v656_v14 = vshll.u32 %v615_v2, 16 }
  0xd6   : > { %v2062_v0 = vsel %vm2020_vm4, 0, %v530_v56 }
  0xd7   : > { %822 = vrot.lane.b32.xlu1 %v647_v48, %s1798_s27  ;;  %v759_v10 = vrot.slane %v2062_v0, 1  ;;  %v651_v12 = vshll.u32 %v2062_v0, 16  ;;  %v649_v20 = vshrl.u32 %v2062_v0, 16  ;;  %v658_v28 = vrot.slane %v656_v14, 1 }
  0xd9   : > { %v350_v54 = vpop.f32.mrf.mxu0  ;;  %v761_v18 = vsel %vm752_vm5, %v759_v10, %v760_v11  ;;  %v653_v21 = vrot.slane %v651_v12, 1 }
  0xda   : > { %720 = vrot.lane.b32.xlu0 %v635_v50, %s1799_s12  ;;  %722 = vrot.lane.b32.xlu2 %v647_v48, %s1799_s12  ;;  %v447_v58 = vpack.c.bf16 %v350_v54, %v350_v54 }
  0xdb   : > { %v654_v27 = vor.u32 %v653_v21, %v649_v20 }
  0xdc   : > { %v487_v1 = vunpack.c.l.b16 %v447_v58 }
  0xdd   : > { %v659_v31 = vsel %vm623_vm6, %v654_v27, %v658_v28 }
  0xde   : > { %v503_v7 = vpack.c.b16 %v487_v1, %v486_v63 }
  0xdf   : > { %796 = vrot.lane.b32.xlu1 %v2062_v0, %s1794_s10 }
  0xe0   : > { %v532_v15 = vshrl.u32 %v503_v7, 16  ;;  %v535_v26 = vshll.u32 %v503_v7, 16 }
  0xe1   : > { %v353_v5 = vpop.f32.mrf.mxu0 }
  0xe2   : > { %899 = vrot.lane.b32.xlu0 %v821_v3, %s1800_s17  ;;  %919 = vrot.lane.b32.xlu2 %v2070_v4, %s1801_s29  ;;  %v534_v24 = vrot.slane %v532_v15, 7  ;;  %v448_v32 = vpack.c.bf16 %v353_v5, %v353_v5 }
  0xe4   : > { %v537_v29 = vor.u32 %v535_v26, %v534_v24  ;;  %v488_v36 = vunpack.c.l.b16 %v448_v32  ;;  %v616_v39 = vsel %vm2020_vm4, %v534_v24, 0 }
  0xe5   : > { %v668_v44 = vshll.u32 %v616_v39, 16  ;;  %v763_v47 = vrot.slane %v616_v39, 1 }
  0xe6   : > { %v2089_v35 = vsel %vm2020_vm4, 0, %v537_v29 }
  0xe7   : > { %907 = vrot.lane.b32.xlu1 %v761_v18, %s1801_s29  ;;  %v663_v38 = vshll.u32 %v2089_v35, 16  ;;  %v661_v42 = vshrl.u32 %v2089_v35, 16  ;;  %v762_v46 = vrot.slane %v2089_v35, 1  ;;  %v670_v53 = vrot.slane %v668_v44, 1 }
  0xe9   : > { %v355_v23 = vpop.f32.mrf.mxu0  ;;  %v665_v43 = vrot.slane %v663_v38, 1  ;;  %v764_v54 = vsel %vm752_vm5, %v762_v46, %v763_v47 }
  0xea   : > { %836 = vrot.lane.b32.xlu0 %v821_v3, %s1798_s27  ;;  %859 = vrot.lane.b32.xlu2 %v2062_v0, %s1797_s16  ;;  %v449_v33 = vpack.c.bf16 %v355_v23, %v355_v23 }
  0xeb   : > { %v666_v52 = vor.u32 %v665_v43, %v661_v42 }
  0xec   : > { %v489_v37 = vunpack.c.l.b16 %v449_v33 }
  0xed   : > { %v671_v59 = vsel %vm623_vm6, %v666_v52, %v670_v53 }
  0xee   : > { %v504_v40 = vpack.c.b16 %v489_v37, %v488_v36 }
  0xef   : > { %724 = vrot.lane.b32.xlu1 %v659_v31, %s1799_s12 }
  0xf0   : > { %v539_v49 = vshrl.u32 %v504_v40, 16  ;;  %v542_v57 = vshll.u32 %v504_v40, 16 }
  0xf1   : > { %v358_v34 = vpop.f32.mrf.mxu0 }
  0xf2   : > { %844 = vrot.lane.b32.xlu0 %v761_v18, %s1796_s9  ;;  %824 = vrot.lane.b32.xlu2 %v659_v31, %s1798_s27  ;;  %v450_v41 = vpack.c.bf16 %v358_v34, %v358_v34  ;;  %v541_v56 = vrot.slane %v539_v49, 7 }
  0xf4   : > { %v490_v50 = vunpack.c.l.b16 %v450_v41  ;;  %v544_v61 = vor.u32 %v542_v57, %v541_v56  ;;  %v617_v63 = vsel %vm2020_vm4, %v541_v56, 0  ;;  %v423_v56 = vpop.f32.mrf.mxu2 }
  0xf5   : > { %v766_v11 = vrot.slane %v617_v63, 1  ;;  %v680_v26 = vshll.u32 %v617_v63, 16 }
  0xf6   : > { %v2110_v1 = vsel %vm2020_vm4, 0, %v544_v61 }
  0xf7   : > { %861 = vrot.lane.b32.xlu1 %v2089_v35, %s1797_s16  ;;  %v765_v10 = vrot.slane %v2110_v1, 1  ;;  %v675_v14 = vshll.u32 %v2110_v1, 16  ;;  %v673_v23 = vshrl.u32 %v2110_v1, 16  ;;  %v682_v32 = vrot.slane %v680_v26, 1 }
  0xf9   : > { %v360_v45 = vpop.f32.mrf.mxu0  ;;  %v2118_v21 = vsel %vm752_vm5, %v765_v10, %v766_v11  ;;  %v677_v24 = vrot.slane %v675_v14, 1 }
  0xfa   : > { %781 = vrot.lane.b32.xlu0 %v761_v18, %s1795_s26  ;;  %798 = vrot.lane.b32.xlu2 %v2089_v35, %s1794_s10  ;;  %v451_v48 = vpack.c.bf16 %v360_v45, %v360_v45 }
  0xfc   : > { %v491_v51 = vunpack.c.l.b16 %v451_v48 }
  0xfe   : > { %v505_v58 = vpack.c.b16 %v491_v51, %v490_v50 }
  0xff   : > { %846 = vrot.lane.b32.xlu1 %v764_v54, %s1796_s9 }
 0x100   : > { %v546_v62 = vshrl.u32 %v505_v58, 16  ;;  %v549_v3 = vshll.u32 %v505_v58, 16 }
 0x101   : > { %v363_v60 = vpop.f32.mrf.mxu0 }
 0x102   : > { %887 = vrot.lane.b32.xlu0 %v659_v31, %s1800_s17  ;;  %889 = vrot.lane.b32.xlu2 %v671_v59, %s1800_s17  ;;  %v548_v2 = vrot.slane %v546_v62, 7  ;;  %v452_v5 = vpack.c.bf16 %v363_v60, %v363_v60  ;;  %v678_v31 = vor.u32 %v677_v24, %v673_v23  ;;  %v436_v62 = vstv %s435_s14 }
 0x103   : > { %vm437_vm7 = vcmp.eq.s32.totalorder %v436_v62, 1 }
 0x104   : > { %v551_v15 = vor.u32 %v549_v3, %v548_v2  ;;  %v492_v18 = vunpack.c.l.b16 %v452_v5  ;;  %v618_v34 = vsel %vm2020_vm4, %v548_v2, 0  ;;  %v2134_v37 = vsel %vm623_vm6, %v678_v31, %v682_v32 }
 0x105   : > { %v692_v40 = vshll.u32 %v618_v34, 16  ;;  %v769_v50 = vrot.slane %v618_v34, 1 }
 0x106   : > { %v2123_v27 = vsel %vm2020_vm4, 0, %v551_v15 }
 0x107   : > { %783 = vrot.lane.b32.xlu1 %v764_v54, %s1795_s26  ;;  %v687_v33 = vshll.u32 %v2123_v27, 16  ;;  %v685_v38 = vshrl.u32 %v2123_v27, 16  ;;  %v694_v46 = vrot.slane %v692_v40, 1  ;;  %v768_v49 = vrot.slane %v2123_v27, 1 }
 0x109   : > { %v365_v7 = vpop.f32.mrf.mxu0  ;;  %v689_v39 = vrot.slane %v687_v33, 1  ;;  %v2155_v57 = vsel %vm752_vm5, %v768_v49, %v769_v50  ;;  %v1511_v49 = vld [vmem:[%s2516_s4 + $0x30] sm:$0xff] }
 0x10a   : > { %909 = vrot.lane.b32.xlu0 %v764_v54, %s1801_s29  ;;  %726 = vrot.lane.b32.xlu2 %v671_v59, %s1799_s12  ;;  %v453_v12 = vpack.c.bf16 %v365_v7, %v365_v7  ;;  %v425_v7 = vpop.f32.mrf.mxu2 }
 0x10b   : > { %v690_v45 = vor.u32 %v689_v39, %v685_v38 }
 0x10c   : > { %v493_v20 = vunpack.c.l.b16 %v453_v12 }
 0x10d   : > { %v2146_v52 = vsel %vm623_vm6, %v690_v45, %v694_v46 }
 0x10e   : > { %v506_v28 = vpack.c.b16 %v493_v20, %v492_v18  ;;  %v438_v18 = vsel %vm437_vm7, %v423_v56, 0.0  ;;  %v439_v20 = vsel %vm437_vm7, %v425_v7, 0.0  ;;  %v1504_v56 = vld [vmem:[%s2513_s1 + $0x8] sm:$0xff]  ;;  %v1503_v7 = vld [vmem:[%s2513_s1] sm:$0xff] }
 0x10f   : > { %911 = vrot.lane.b32.xlu1 %v2118_v21, %s1801_s29  ;;  %v459_v31 = vpack.c.bf16 %v439_v20, %v439_v20  ;;  %1102 = vmatpush.bf16.msra.mxu3 %v1504_v56  ;;  %v1508_v20 = vld [vmem:[%s2516_s4 + $0x18] sm:$0xff] }
 0x110   : > { %v553_v36 = vshrl.u32 %v506_v28, 16  ;;  %v556_v42 = vshll.u32 %v506_v28, 16 }
 0x111   : > { %v368_v29 = vpop.f32.mrf.mxu0 }
 0x112   : > { %826 = vrot.lane.b32.xlu0 %v671_v59, %s1798_s27  ;;  %863 = vrot.lane.b32.xlu2 %v2110_v1, %s1797_s16  ;;  %v555_v41 = vrot.slane %v553_v36, 7  ;;  %v454_v44 = vpack.c.bf16 %v368_v29, %v368_v29  ;;  %v458_v29 = vpack.c.bf16 %v438_v18, %v438_v18  ;;  %v499_v36 = vunpack.c.l.b16 %v459_v31  ;;  %v1506_v31 = vld [vmem:[%s2516_s4 + $0x8] sm:$0xff] }
 0x113   : > { %1103 = vmatpush.bf16.msra.mxu3 %v1503_v7 }
 0x114   : > { %v558_v48 = vor.u32 %v556_v42, %v555_v41  ;;  %v494_v51 = vunpack.c.l.b16 %v454_v44  ;;  %v619_v60 = vsel %vm2020_vm4, %v555_v41, 0  ;;  %v498_v34 = vunpack.c.l.b16 %v458_v29  ;;  %v1512_v42 = vld [vmem:[%s2516_s4 + $0x38] sm:$0xff] }
 0x115   : > { %v704_v5 = vshll.u32 %v619_v60, 16  ;;  %v772_v24 = vrot.slane %v619_v60, 1  ;;  %1209 = vmatpush.bf16.msrb.mxu1 %v1512_v42  ;;  %1516 = vmatpush.bf16.msra.mxu2 %v1512_v42  ;;  %v1505_v42 = vld [vmem:[%s2516_s4] sm:$0xff] }
 0x116   : > { %v2150_v54 = vsel %vm2020_vm4, 0, %v558_v48  ;;  %v509_v41 = vpack.c.b16 %v499_v36, %v498_v34  ;;  %1444 = vmatmul.msk.bf16.vlgmr.msra.gmra.mxu3 %vm304_vm0, %v1967_v8 }
 0x117   : > { %828 = vrot.lane.b32.xlu1 %v2134_v37, %s1798_s27  ;;  %v699_v59 = vshll.u32 %v2150_v54, 16  ;;  %v697_v2 = vshrl.u32 %v2150_v54, 16  ;;  %v706_v14 = vrot.slane %v704_v5, 1  ;;  %v771_v23 = vrot.slane %v2150_v54, 1 }
 0x118   : > { %v574_v50 = vshrl.u32 %v509_v41, 16 }
 0x119   : > { %v370_v43 = vpop.f32.mrf.mxu0  ;;  %v701_v3 = vrot.slane %v699_v59, 1  ;;  %v2182_v32 = vsel %vm752_vm5, %v771_v23, %v772_v24  ;;  %1210 = vmatpush.bf16.msrb.mxu1 %v1511_v49  ;;  %1517 = vmatpush.bf16.msra.mxu2 %v1511_v49 }
 0x11a   : > { %800 = vrot.lane.b32.xlu0 %v2110_v1, %s1794_s10  ;;  %848 = vrot.lane.b32.xlu2 %v2118_v21, %s1796_s9  ;;  %v455_v47 = vpack.c.bf16 %v370_v43, %v370_v43  ;;  %v576_v62 = vrot.slane %v574_v50, 7 }
 0x11b   : > { %v702_v12 = vor.u32 %v701_v3, %v697_v2  ;;  %v1510_v2 = vld [vmem:[%s2516_s4 + $0x28] sm:$0xff] }
 0x11c   : > { %v495_v53 = vunpack.c.l.b16 %v455_v47 }
 0x11d   : > { %v2177_v28 = vsel %vm623_vm6, %v702_v12, %v706_v14  ;;  %1211 = vmatpush.bf16.msrb.mxu1 %v1510_v2  ;;  %1518 = vmatpush.bf16.msra.mxu2 %v1510_v2 }
 0x11e   : > { %v507_v58 = vpack.c.b16 %v495_v53, %v494_v51 }
 0x11f   : > { %730 = vrot.lane.b32.xlu1 %v2146_v52, %s1799_s12 }
 0x120   : > { %v560_v63 = vshrl.u32 %v507_v58, 16  ;;  %v563_v11 = vshll.u32 %v507_v58, 16 }
 0x122   : > { %891 = vrot.lane.b32.xlu0 %v2134_v37, %s1800_s17  ;;  %787 = vrot.lane.b32.xlu2 %v2155_v57, %s1795_s26  ;;  %v562_v10 = vrot.slane %v560_v63, 7  ;;  %v577_v63 = vshll.u32 %v509_v41, 16 }
 0x124   : > { %v2164_v61 = vpop.permute.xlu2 %842  ;;  %v565_v26 = vor.u32 %v563_v11, %v562_v10  ;;  %v620_v40 = vsel %vm2020_vm4, %v562_v10, 0  ;;  %v1509_v10 = vld [vmem:[%s2516_s4 + $0x20] sm:$0xff]  ;;  %v579_v11 = vor.u32 %v577_v63, %v576_v62 }
 0x125   : > { %v716_v46 = vshll.u32 %v620_v40, 16  ;;  %v775_v48 = vrot.slane %v620_v40, 1  ;;  %1212 = vmatpush.bf16.msrb.mxu1 %v1509_v10  ;;  %1519 = vmatpush.bf16.msra.mxu2 %v1509_v10 }
 0x126   : > { %v2186_v33 = vsel %vm2020_vm4, 0, %v565_v26  ;;  %v612_v18 = vsel %vm2020_vm4, 0, %v579_v11  ;;  %v622_v26 = vsel %vm2020_vm4, %v576_v62, 0  ;;  %1445 = vmatmul.msk.bf16.gmra.mxu3 %vm304_vm0, %v1978_v13 }
 0x127   : > { %893 = vrot.lane.b32.xlu1 %v2146_v52, %s1800_s17  ;;  %v711_v39 = vshll.u32 %v2186_v33, 16  ;;  %v709_v44 = vshrl.u32 %v2186_v33, 16  ;;  %v774_v47 = vrot.slane %v2186_v33, 1  ;;  %v718_v59 = vrot.slane %v716_v46, 1 }
 0x128   : > { %v878_v24 = vshll.u32 %v612_v18, 16  ;;  %v876_v34 = vshrl.u32 %v612_v18, 16  ;;  %v905_v46 = vrot.slane %v622_v26, 1 }
 0x129   : > { %v713_v45 = vrot.slane %v711_v39, 1  ;;  %v776_v60 = vsel %vm752_vm5, %v774_v47, %v775_v48  ;;  %1213 = vmatpush.bf16.msrb.mxu1 %v1508_v20  ;;  %1520 = vmatpush.bf16.msra.mxu2 %v1508_v20  ;;  %v883_v39 = vshll.u32 %v622_v26, 16 }
 0x12a   : > { %865 = vrot.lane.b32.xlu0 %v2123_v27, %s1797_s16  ;;  %913 = vrot.lane.b32.xlu2 %v2155_v57, %s1801_s29  ;;  %v880_v36 = vrot.slane %v878_v24, 1 }
 0x12b   : > { %v714_v58 = vor.u32 %v713_v45, %v709_v44  ;;  %v885_v41 = vrot.slane %v883_v39, 1  ;;  %v904_v45 = vrot.slane %v612_v18, 1 }
 0x12c   : > { %v2173_v15 = vpop.permute.xlu2 %808  ;;  %v881_v55 = vor.u32 %v880_v36, %v876_v34 }
 0x12d   : > { %v719_v5 = vsel %vm623_vm6, %v714_v58, %v718_v59  ;;  %v906_v49 = vsel %vm752_vm5, %v904_v45, %v905_v46 }
 0x12e   : > { %v886_v47 = vsel %vm623_vm6, %v881_v55, %v885_v41 }
 0x12f   : > { %832 = vrot.lane.b32.xlu1 %v2177_v28, %s1798_s27 }
 0x132   : > { %804 = vrot.lane.b32.xlu0 %v2150_v54, %s1794_s10  ;;  %852 = vrot.lane.b32.xlu2 %v2182_v32, %s1796_s9 }
 0x134   : > { %v2192_v38 = vpop.permute.xlu2 %722 }
 0x136   : > { %1446 = vmatmul.msk.bf16.gmra.mxu3 %vm304_vm0, %v1984_v16 }
 0x137   : > { %806 = vrot.lane.b32.xlu1 %v2186_v33, %s1794_s10 }
 0x139   : > { %v2202_v43 = vpop.permute.xlu1 %794 }
 0x13a   : > { %789 = vrot.lane.b32.xlu0 %v2182_v32, %s1795_s26  ;;  %732 = vrot.lane.b32.xlu2 %v2177_v28, %s1799_s12 }
 0x13c   : > { %v2213_v51 = vpop.permute.xlu0 %779  ;;  %v2215_v53 = vpop.permute.xlu2 %919 }
 0x13f   : > { %917 = vrot.lane.b32.xlu1 %v776_v60, %s1801_s29 }
 0x141   : > { %v2225_v3 = vpop.permute.xlu1 %871 }
 0x142   : > { %869 = vrot.lane.b32.xlu0 %v2186_v33, %s1797_s16  ;;  %897 = vrot.lane.b32.xlu2 %v719_v5, %s1800_s17 }
 0x144   : > { %v778_v12 = vpop.permute.xlu0 %777  ;;  %v2237_v14 = vpop.permute.xlu2 %859 }
 0x146   : > { %1447 = vmatmul.msk.bf16.gmra.mxu3 %vm304_vm0, %v1990_v19 }
 0x147   : > { %856 = vrot.lane.b32.xlu1 %v2070_v4, %s1796_s9  ;;  %v1507_v4 = vld [vmem:[%s2516_s4 + $0x10] sm:$0xff] }
 0x148   : > { %1214 = vmatpush.bf16.msrb.mxu1 %v1507_v4  ;;  %1521 = vmatpush.bf16.msra.mxu2 %v1507_v4 }
 0x149   : > { %v823_v23 = vpop.permute.xlu1 %822 }
 0x14a   : > { %854 = vrot.lane.b32.xlu0 %v776_v60, %s1796_s9  ;;  %834 = vrot.lane.b32.xlu2 %v719_v5, %s1798_s27 }
 0x14c   : > { %v721_v8 = vpop.permute.xlu0 %720  ;;  %v2255_v29 = vpop.permute.xlu2 %824  ;;  %1215 = vmatpush.bf16.msrb.mxu1 %v1506_v31  ;;  %1522 = vmatpush.bf16.msra.mxu2 %v1506_v31 }
 0x14d   : > { %v925_v59 = vsel %vm923_vm8, %v2036_v17, %v721_v8 }
 0x14f   : > { %791 = vrot.lane.b32.xlu1 %v776_v60, %s1795_s26 }
 0x150   : > { %1216 = vmatpush.bf16.msrb.mxu1 %v1505_v42  ;;  %1523 = vmatpush.bf16.msra.mxu2 %v1505_v42 }
 0x151   : > { %v797_v40 = vpop.permute.xlu1 %796 }
 0x152   : > { %728 = vrot.lane.b32.xlu0 %v2134_v37, %s1799_s12  ;;  %873 = vrot.lane.b32.xlu2 %v612_v18, %s1797_s16 }
 0x154   : > { %v2267_v44 = vpop.permute.xlu0 %899  ;;  %v2270_v48 = vpop.permute.xlu2 %798 }
 0x156   : > { %1448 = vmatmul.msk.bf16.gmra.mxu3 %vm304_vm0, %v1996_v22 }
 0x157   : > { %901 = vrot.lane.b32.xlu1 %v886_v47, %s1800_s17 }
 0x159   : > { %v908_v37 = vpop.permute.xlu1 %907 }
 0x15a   : > { %921 = vrot.lane.b32.xlu0 %v906_v49, %s1801_s29  ;;  %785 = vrot.lane.b32.xlu2 %v2118_v21, %s1795_s26  ;;  %v942_v21 = vsel %vm940_vm9, %v925_v59, %v778_v12 }
 0x15b   : > { %v959_v17 = vsel %vm957_vm10, %v942_v21, %v2202_v43 }
 0x15c   : > { %v2279_v50 = vpop.permute.xlu0 %836  ;;  %v890_v56 = vpop.permute.xlu2 %889  ;;  %v975_v63 = vsel %vm304_vm0, %v959_v17, %v823_v23 }
 0x15d   : > { %v992_v2 = vsel %vm990_vm11, %v975_v63, %v2164_v61 }
 0x15f   : > { %802 = vrot.lane.b32.xlu1 %v2123_v27, %s1794_s10 }
 0x161   : > { %v725_v58 = vpop.permute.xlu1 %724 }
 0x162   : > { %734 = vrot.lane.b32.xlu0 %v719_v5, %s1799_s12  ;;  %830 = vrot.lane.b32.xlu2 %v2146_v52, %s1798_s27 }
 0x164   : > { %v845_v13 = vpop.permute.xlu0 %844  ;;  %v727_v52 = vpop.permute.xlu2 %726 }
 0x165   : > { %v931_v42 = vsel %vm923_vm8, %v2089_v35, %v727_v52 }
 0x166   : > { %1449 = vmatmul.msk.bf16.gmra.mxu3 %vm304_vm0, %v2005_v25 }
 0x167   : > { %867 = vrot.lane.b32.xlu1 %v2150_v54, %s1797_s16 }
 0x169   : > { %v862_v60 = vpop.permute.xlu1 %861 }
 0x16a   : > { %850 = vrot.lane.b32.xlu0 %v2155_v57, %s1796_s9  ;;  %895 = vrot.lane.b32.xlu2 %v2177_v28, %s1800_s17  ;;  %v1009_v57 = vsel %vm1007_vm12, %v992_v2, %v2237_v14  ;;  %s256_s9 = sand.u32 1, %s1754_s19   ;;  %s1513_s17 = sshll.u32 %s1774_s24, 4 }
 0x16b   : > { %s1412_s16 = sshll.u32 %s256_s9, 7  ;;  %s1292_s13 = scalar_lea.sflag [#allocation4], %s256_s9 }
 0x16c   : > { %v782_v62 = vpop.permute.xlu0 %781  ;;  %v864_v43 = vpop.permute.xlu2 %863  ;;  %s2407_s27 = scalar_lea.vmem [#allocation5], %s1412_s16 }
 0x171   : > { %v847_v16 = vpop.permute.xlu1 %846 }
 0x172   : > { %915 = vrot.lane.b32.xlu0 %v2182_v32, %s1801_s29  ;;  %v927_v32 = vsel %vm923_vm8, %v2028_v6, %v2192_v38  ;;  %v929_v38 = vsel %vm923_vm8, %v2062_v0, %v725_v58  ;;  %s1495_s29 = sshll.u32 %s1778_s25, 5  ;;  %s1307_s25 = sshll.u32 %s2407_s27, 4  ;;  %s1308_s25 = int_to_ptr.vmem [resolvable:$true] %s1307_s25 }
 0x173   : > { %v944_v10 = vsel %vm940_vm9, %v927_v32, %v2213_v51  ;;  %v946_v8 = vsel %vm940_vm9, %v929_v38, %v782_v62  ;;  %s1304_s14 = sadd.s32 %s1513_s17, %s1495_s29  ;;  %s1688_s17 = scalar_lea.hbm %s2517_s5, 512 }
 0x174   : > { %v888_v28 = vpop.permute.xlu0 %887  ;;  %v961_v12 = vsel %vm957_vm10, %v944_v10, %v797_v40  ;;  %v849_v14 = vpop.permute.xlu2 %848  ;;  %v963_v31 = vsel %vm957_vm10, %v946_v8, %v2270_v48  ;;  %s1496_s8 = sshll.u32 %s1304_s14, 3 }
 0x175   : > { %v1026_v5 = vsel %vm1024_vm14, %v1009_v57, %v888_v28  ;;  %v977_v18 = vsel %vm304_vm0, %v961_v12, %v2255_v29  ;;  %s1306_s24 = scalar_lea.hbm %s2517_s5, %s1496_s8 }
 0x176   : > { %v1043_v7 = vsel %vm1041_vm13, %v1026_v5, %v908_v37  ;;  %v994_v20 = vsel %vm990_vm11, %v977_v18, %v845_v13  ;;  %1450 = vmatmul.msk.bf16.gmra.mxu3 %vm304_vm0, %v2014_v30  ;;  %s1309_s7 = sshll.u32 %s1306_s24, 4  ;;  %s1310_s7 = int_to_ptr.hbm [resolvable:$true] %s1309_s7 }
 0x177   : > { %1484 = vmatmul.msk.bf16.vlgmr.msrb.gmra.mxu1 %vm1058_vm15, %v1043_v7  ;;  %v1011_v19 = vsel %vm1007_vm12, %v994_v20, %v862_v60  ;;  %s1682_s6 = sshra.s32 %s1310_s7, 4  ;;  %s1683_s6 = int_to_ptr.hbm [resolvable:$true] %s1682_s6 }
 0x178   : > { %v1028_v4 = vsel %vm1024_vm14, %v1011_v19, %v890_v56  ;;  %s1684_s10 = scalar_lea.hbm %s1683_s6, 128  ;;  %p1689_p1 = scmp.lt.s32.totalorder %s1683_s6, %s2517_s5 }
 0x179   : > { %v784_v61 = vpop.permute.xlu1 %783  ;;  %p1685_p11 = scmp.ne.s32.totalorder %s1683_s6, %s1684_s10  ;;  %p1690_p4 = scmp.lt.s32.totalorder %s1688_s17, %s1684_s10 }
 0x17a   : > { %v948_v45 = vsel %vm940_vm9, %v931_v42, %v784_v61 }
 0x17b   : > { %p1686_p13 = pnand %p1685_p11, %p1915_p12  ;;  %p1691_p5 = por %p1690_p4, %p1689_p1 }
 0x17c   : > { %v910_v11 = vpop.permute.xlu0 %909  ;;  %v788_v51 = vpop.permute.xlu2 %787 }
 0x17d   : > { %v1045_v6 = vsel %vm1041_vm13, %v1028_v4, %v910_v11  ;;  %p1687_p0 = pneg %p1686_p13 }
 0x17f   : > { %p1692_p6 = pnand %p1691_p5, %p1687_p0 }
 0x181   : > { %v912_v23 = vpop.permute.xlu1 %911 }
 0x184   : > { %v827_v24 = vpop.permute.xlu0 %826  ;;  %v914_v40 = vpop.permute.xlu2 %913 }
 0x185   : > { %v979_v34 = vsel %vm304_vm0, %v963_v31, %v827_v24 }
 0x186   : > { %v996_v36 = vsel %vm990_vm11, %v979_v34, %v847_v16  ;;  %1451 = vmatmul.msk.bf16.gmra.mxu3 %vm304_vm0, %v1969_v9 }
 0x187   : > { %1485 = vmatmul.msk.bf16.gmra.mxu1 %vm1058_vm15, %v1045_v6  ;;  %v1013_v55 = vsel %vm1007_vm12, %v996_v36, %v864_v43 }
 0x189   : > { %v829_v26 = vpop.permute.xlu1 %828 }
 0x18c   : > { %v801_v29 = vpop.permute.xlu0 %800  ;;  %v853_v49 = vpop.permute.xlu2 %852 }
 0x18d   : > { %v965_v46 = vsel %vm957_vm10, %v948_v45, %v801_v29 }
 0x18e   : > { %v981_v48 = vsel %vm304_vm0, %v965_v46, %v829_v26 }
 0x18f   : > { %v998_v56 = vsel %vm990_vm11, %v981_v48, %v849_v14 }
 0x191   : > { %v731_v39 = vpop.permute.xlu1 %730 }
 0x192   : > { %v935_v17 = vsel %vm923_vm8, %v2123_v27, %v731_v39 }
 0x193   : > { %v952_v62 = vsel %vm940_vm9, %v935_v17, %v788_v51 }
 0x194   : > { %v892_v22 = vpop.permute.xlu0 %891  ;;  %v733_v25 = vpop.permute.xlu2 %732 }
 0x195   : > { %v1030_v41 = vsel %vm1024_vm14, %v1013_v55, %v892_v22  ;;  %v937_v30 = vsel %vm923_vm8, %v2150_v54, %v733_v25 }
 0x196   : > { %v1047_v0 = vsel %vm1041_vm13, %v1030_v41, %v912_v23 }
 0x197   : > { %1486 = vmatmul.msk.bf16.gmra.mxu1 %vm1058_vm15, %v1047_v0 }
 0x199   : > { %v894_v47 = vpop.permute.xlu1 %893  ;;  %v1105_v4 = vpop.f32.mrf.mxu3 }
 0x19c   : > { %v866_v37 = vpop.permute.xlu0 %865  ;;  %v898_v16 = vpop.permute.xlu2 %897 }
 0x19d   : > { %v1015_v58 = vsel %vm1007_vm12, %v998_v56, %v866_v37  ;;  %v2401_v56 = vld [vmem:[%s2514_s2] ss:$0 sm:$0xff] }
 0x19e   : > { %v1032_v35 = vsel %vm1024_vm14, %v1015_v58, %v894_v47  ;;  %v1106_v58 = vadd.f32 %v2401_v56, %v1105_v4 }
 0x19f   : > { %v1049_v21 = vsel %vm1041_vm13, %v1032_v35, %v914_v40 }
 0x1a1   : > { %v833_v13 = vpop.permute.xlu1 %832 }
 0x1a4   : > { %v805_v59 = vpop.permute.xlu0 %804  ;;  %v835_v11 = vpop.permute.xlu2 %834 }
 0x1a5   : > { %v969_v63 = vsel %vm957_vm10, %v952_v62, %v805_v59 }
 0x1a6   : > { %v985_v2 = vsel %vm304_vm0, %v969_v63, %v833_v13 }
 0x1a7   : > { %1487 = vmatmul.msk.bf16.gmra.mxu1 %vm1058_vm15, %v1049_v21  ;;  %v1002_v28 = vsel %vm990_vm11, %v985_v2, %v853_v49 }
 0x1a9   : > { %v807_v60 = vpop.permute.xlu1 %806 }
 0x1ac   : > { %v790_v52 = vpop.permute.xlu0 %789  ;;  %v874_v9 = vpop.permute.xlu2 %873 }
 0x1ad   : > { %v954_v27 = vsel %vm940_vm9, %v937_v30, %v790_v52 }
 0x1ae   : > { %v971_v10 = vsel %vm957_vm10, %v954_v27, %v807_v60 }
 0x1af   : > { %v987_v14 = vsel %vm304_vm0, %v971_v10, %v835_v11 }
 0x1b1   : > { %v918_v57 = vpop.permute.xlu1 %917 }
 0x1b4   : > { %v870_v43 = vpop.permute.xlu0 %869  ;;  %v786_v51 = vpop.permute.xlu2 %785 }
 0x1b5   : > { %v1019_v5 = vsel %vm1007_vm12, %v1002_v28, %v870_v43 }
 0x1b6   : > { %v1036_v7 = vsel %vm1024_vm14, %v1019_v5, %v898_v16 }
 0x1b7   : > { %v1053_v61 = vsel %vm1041_vm13, %v1036_v7, %v918_v57 }
 0x1b8   : > { %1489 = vmatmul.msk.bf16.vlgmr.msra.gmra.mxu2 %vm1058_vm15, %v1053_v61 }
 0x1b9   : > { %v857_v32 = vpop.permute.xlu1 %856 }
 0x1bc   : > { %v855_v12 = vpop.permute.xlu0 %854  ;;  %v831_v36 = vpop.permute.xlu2 %830 }
 0x1bd   : > { %v1004_v54 = vsel %vm990_vm11, %v987_v14, %v855_v12 }
 0x1be   : > { %v1021_v18 = vsel %vm1007_vm12, %v1004_v54, %v2225_v3  ;;  %v1107_v3 = vpop.f32.mrf.mxu3 }
 0x1bf   : > { %v1038_v19 = vsel %vm1024_vm14, %v1021_v18, %v2267_v44  ;;  %v1108_v21 = vadd.f32 %v2401_v56, %v1107_v3 }
 0x1c0   : > { %v1055_v24 = vsel %vm1041_vm13, %v1038_v19, %v2215_v53 }
 0x1c1   : > { %v792_v20 = vpop.permute.xlu1 %791 }
 0x1c4   : > { %v729_v23 = vpop.permute.xlu0 %728  ;;  %v896_v46 = vpop.permute.xlu2 %895 }
 0x1c5   : > { %v933_v29 = vsel %vm923_vm8, %v2110_v1, %v729_v23 }
 0x1c6   : > { %v950_v39 = vsel %vm940_vm9, %v933_v29, %v786_v51  ;;  %v1110_v0 = vpop.f32.mrf.mxu3 }
 0x1c7   : > { %v1111_v52 = vadd.f32 %v2401_v56, %v1110_v0 }
 0x1c8   : > { %1490 = vmatmul.msk.bf16.gmra.mxu2 %vm1058_vm15, %v1055_v24 }
 0x1c9   : > { %v902_v6 = vpop.permute.xlu1 %901 }
 0x1cc   : > { %v922_v38 = vpop.permute.xlu0 %921 }
 0x1ce   : > { %v1112_v49 = vpop.f32.mrf.mxu3 }
 0x1cf   : > { %v1113_v2 = vadd.f32 %v2401_v56, %v1112_v49 }
 0x1d1   : > { %v803_v31 = vpop.permute.xlu1 %802 }
 0x1d4   : > { %v735_v26 = vpop.permute.xlu0 %734 }
 0x1d5   : > { %v939_v8 = vsel %vm923_vm8, %v2186_v33, %v735_v26  ;;  %v967_v33 = vsel %vm957_vm10, %v950_v39, %v803_v31 }
 0x1d6   : > { %v956_v44 = vsel %vm940_vm9, %v939_v8, %v792_v20  ;;  %v1115_v13 = vpop.f32.mrf.mxu3 }
 0x1d7   : > { %v973_v53 = vsel %vm957_vm10, %v956_v44, %v2173_v15  ;;  %v983_v15 = vsel %vm304_vm0, %v967_v33, %v831_v36  ;;  %v1116_v43 = vadd.f32 %v2401_v56, %v1115_v13 }
 0x1d8   : > { %v989_v34 = vsel %vm304_vm0, %v973_v53, %v2279_v50  ;;  %vm1274_vm0 = vcmask 785408  }
 0x1d9   : > { %v1006_v40 = vsel %vm990_vm11, %v989_v34, %v857_v32  ;;  %v868_v42 = vpop.permute.xlu1 %867 }
 0x1da   : > { %v1023_v55 = vsel %vm1007_vm12, %v1006_v40, %v874_v9 }
 0x1db   : > { %v1040_v1 = vsel %vm1024_vm14, %v1023_v55, %v902_v6 }
 0x1dc   : > { %v851_v22 = vpop.permute.xlu0 %850  ;;  %v1057_v41 = vsel %vm1041_vm13, %v1040_v1, %v922_v38 }
 0x1dd   : > { %1491 = vmatmul.msk.bf16.gmra.mxu2 %vm1058_vm15, %v1057_v41  ;;  %v1000_v50 = vsel %vm990_vm11, %v983_v15, %v851_v22 }
 0x1de   : > { %v1017_v45 = vsel %vm1007_vm12, %v1000_v50, %v868_v42  ;;  %v1117_v17 = vpop.f32.mrf.mxu3 }
 0x1df   : > { %v1034_v48 = vsel %vm1024_vm14, %v1017_v45, %v896_v46  ;;  %v1118_v27 = vadd.f32 %v2401_v56, %v1117_v17 }
 0x1e4   : > { %v916_v47 = vpop.permute.xlu0 %915 }
 0x1e5   : > { %v1051_v37 = vsel %vm1041_vm13, %v1034_v48, %v916_v47 }
 0x1e6   : > { %1488 = vmatmul.msk.bf16.gmra.mxu1 %vm1058_vm15, %v1051_v37  ;;  %v1120_v16 = vpop.f32.mrf.mxu3 }
 0x1e7   : > { %v1121_v11 = vadd.f32 %v2401_v56, %v1120_v16 }
 0x1ee   : > { %v1122_v5 = vpop.f32.mrf.mxu3 }
 0x1ef   : > { %v1123_v18 = vadd.f32 %v2401_v56, %v1122_v5 }
 0x1f4   : > { %v1218_v35 = vpop.f32.mrf.mxu1 }
 0x1f5   : > { %v1258_v59 = vadd.f32 %v1218_v35, %v1106_v58 }
 0x1f6   : > { %v1125_v61 = vpop.f32.mrf.mxu3 }
 0x1f7   : > { %1275 = vst.msk [vmem:[%s2407_s27] sm:$0xff] %vm1274_vm0, %v1258_v59  ;;  %v1126_v1 = vadd.f32 %v2401_v56, %v1125_v61 }
 0x1fc   : > { %v1220_v25 = vpop.f32.mrf.mxu1 }
 0x1fd   : > { %v1259_v60 = vadd.f32 %v1220_v25, %v1108_v21 }
 0x1fe   : > { %v1127_v54 = vpop.f32.mrf.mxu3 }
 0x1ff   : > { %1276 = vst.msk [vmem:[%s2407_s27 + $0x8] sm:$0xff] %vm1274_vm0, %v1259_v60  ;;  %v1128_v45 = vadd.f32 %v2401_v56, %v1127_v54 }
 0x204   : > { %v1223_v62 = vpop.f32.mrf.mxu1 }
 0x205   : > { %v1260_v63 = vadd.f32 %v1223_v62, %v1111_v52 }
 0x206   : > { %v1130_v19 = vpop.f32.mrf.mxu3 }
 0x207   : > { %1277 = vst.msk [vmem:[%s2407_s27 + $0x10] sm:$0xff] %vm1274_vm0, %v1260_v63  ;;  %v1131_v9 = vadd.f32 %v2401_v56, %v1130_v19 }
 0x20c   : > { %v1225_v57 = vpop.f32.mrf.mxu1 }
 0x20d   : > { %v1261_v28 = vadd.f32 %v1225_v57, %v1113_v2 }
 0x20e   : > { %v1132_v24 = vpop.f32.mrf.mxu3 }
 0x20f   : > { %1278 = vst.msk [vmem:[%s2407_s27 + $0x18] sm:$0xff] %vm1274_vm0, %v1261_v28  ;;  %v1133_v38 = vadd.f32 %v2401_v56, %v1132_v24 }
 0x214   : > { %v1228_v30 = vpop.f32.mrf.mxu1 }
 0x215   : > { %v1262_v7 = vadd.f32 %v1228_v30, %v1116_v43 }
 0x216   : > { %v1135_v26 = vpop.f32.mrf.mxu3 }
 0x217   : > { %1279 = vst.msk [vmem:[%s2407_s27 + $0x20] sm:$0xff] %vm1274_vm0, %v1262_v7  ;;  %v1136_v3 = vadd.f32 %v2401_v56, %v1135_v26 }
 0x21c   : > { %v1230_v32 = vpop.f32.mrf.mxu1 }
 0x21d   : > { %v1263_v10 = vadd.f32 %v1230_v32, %v1118_v27 }
 0x21e   : > { %v1137_v44 = vpop.f32.mrf.mxu3 }
 0x21f   : > { %1280 = vst.msk [vmem:[%s2407_s27 + $0x28] sm:$0xff] %vm1274_vm0, %v1263_v10  ;;  %v1138_v53 = vadd.f32 %v2401_v56, %v1137_v44 }
 0x224   : > { %v1233_v12 = vpop.f32.mrf.mxu1 }
 0x225   : > { %v1264_v14 = vadd.f32 %v1233_v12, %v1121_v11 }
 0x226   : > { %v1140_v39 = vpop.f32.mrf.mxu3 }
 0x227   : > { %1281 = vst.msk [vmem:[%s2407_s27 + $0x30] sm:$0xff] %vm1274_vm0, %v1264_v14  ;;  %v1141_v40 = vadd.f32 %v2401_v56, %v1140_v39 }
 0x22c   : > { %v1235_v20 = vpop.f32.mrf.mxu1 }
 0x22d   : > { %v1265_v23 = vadd.f32 %v1235_v20, %v1123_v18 }
 0x22e   : > { %v1142_v41 = vpop.f32.mrf.mxu3 }
 0x22f   : > { %1282 = vst.msk [vmem:[%s2407_s27 + $0x38] sm:$0xff] %vm1274_vm0, %v1265_v23  ;;  %v1143_v50 = vadd.f32 %v2401_v56, %v1142_v41 }
 0x23b   : > { %v1243_v4 = vpop.f32.mrf.mxu2 }
 0x23c   : > { %v1268_v6 = vadd.f32 %v1243_v4, %v1131_v9 }
 0x23e   : > { %1285 = vst.msk [vmem:[%s2407_s27 + $0x50] sm:$0xff] %vm1274_vm0, %v1268_v6 }
 0x243   : > { %v1245_v51 = vpop.f32.mrf.mxu2 }
 0x244   : > { %v1269_v8 = vadd.f32 %v1245_v51, %v1133_v38 }
 0x246   : > { %1286 = vst.msk [vmem:[%s2407_s27 + $0x58] sm:$0xff] %vm1274_vm0, %v1269_v8 }
 0x24b   : > { %v1248_v29 = vpop.f32.mrf.mxu2 }
 0x24c   : > { %v1270_v31 = vadd.f32 %v1248_v29, %v1136_v3 }
 0x24e   : > { %1287 = vst.msk [vmem:[%s2407_s27 + $0x60] sm:$0xff] %vm1274_vm0, %v1270_v31 }
 0x253   : > { %v1250_v34 = vpop.f32.mrf.mxu2 }
 0x254   : > { %v1271_v36 = vadd.f32 %v1250_v34, %v1138_v53 }
 0x256   : > { %1288 = vst.msk [vmem:[%s2407_s27 + $0x68] sm:$0xff] %vm1274_vm0, %v1271_v36 }
 0x260   : > { %v1253_v33 = vpop.f32.mrf.mxu2 }
 0x261   : > { %v1272_v55 = vadd.f32 %v1253_v33, %v1141_v40 }
 0x263   : > { %1289 = vst.msk [vmem:[%s2407_s27 + $0x70] sm:$0xff] %vm1274_vm0, %v1272_v55  ;;  %v1238_v22 = vpop.f32.mrf.mxu1 }
 0x264   : > { %v1266_v15 = vadd.f32 %v1238_v22, %v1126_v1 }
 0x266   : > { %1283 = vst.msk [vmem:[%s2407_s27 + $0x40] sm:$0xff] %vm1274_vm0, %v1266_v15 }
 0x268   : > { %v1255_v0 = vpop.f32.mrf.mxu2 }
 0x269   : > { %v1273_v42 = vadd.f32 %v1255_v0, %v1143_v50 }
 0x26b   : > { %1290 = vst.msk [vmem:[%s2407_s27 + $0x78] sm:$0xff] %vm1274_vm0, %v1273_v42  ;;  %v1240_v46 = vpop.f32.mrf.mxu1 }
 0x26c   : > { %v1267_v47 = vadd.f32 %v1240_v46, %v1128_v45 }
 0x26e   : > { %1284 = vst.msk [vmem:[%s2407_s27 + $0x48] sm:$0xff] %vm1274_vm0, %v1267_v47 }
 0x26f   : > { %1695 = shalt.err (!%p1692_p6)
}
 0x270   : > { %s1802_s9 = smov 128  }
 0x271   : > { %1526 = dma.vmem_to_hbm [thread:$0]  (%p1915_p12), %s1308_s25, 2048, %s1310_s7, %s1292_s13, %s1802_s9, %s1802_s9, %s1799_s12  }
 0x272 PF: > { %p1537_p8 = scmp.ge.s32.totalorder %s1790_s28, 2  ;;  %s1324_s27 = sand.u32 1, %s1750_s18  }
 0x273   : > { %s1325_s8 = scalar_lea.sflag [#allocation4], %s1324_s27 }
 0x274   : > { %p1533_p3 = pnand %p1537_p8, %p1928_p2 }
 0x276   : > { %p1534_p7 = pneg %p1533_p3 }
 0x278   : > { %1745 = dma.done.wait (%p1534_p7), %s1325_s8, 2048  }
 0x279   : > { %1747 = vsyncadd (%p1534_p7), %s1325_s8, 4294965248  ;;  %s21_s28 = sadd.s32 1, %s1790_s28   ;;  %s2534_s15 = sld [smem:[#allocation13_spill]] }
 0x27a   : > { %p18_p9 = scmp.ge.s32.totalorder %s21_s28, 6   ;;  %s2535_s12 = sld [smem:[#allocation12_spill]] }
 0x27b   : > { %s2536_s24 = sld [smem:[#allocation8_spill]]  ;;  %s2540_s18 = smov %s1754_s19 }
 0x27c   : > { %s2537_s25 = sld [smem:[#allocation9_spill]]  ;;  %s2541_s19 = smov %s1758_s20 }
 0x27d   : > { %s2538_s26 = sld [smem:[#allocation10_spill]]  ;;  %s2543_s21 = smov %s1766_s22 }
 0x27e   : > { %s2539_s27 = sld [smem:[#allocation11_spill]]  ;;  %s2544_s22 = smov %s1770_s23 }
 0x27f   : > { %s2542_s20 = smov %s2534_s15  ;;  %20 = sbr.rel (!%p18_p9) target bundleno = 9 (0x9), region = 88 }
 0x280   : > { %s2545_s23 = smov %s2535_s12 }
 0x284   :  { %1331 = vsyncpa [#allocation3], 1 }
 0x285   :  { %1333 = vsyncpa [#allocation3 + $0x1], 1 }
 0x286   :  { %1334 = vsyncpa [#allocation4], 1 }
 0x287   :  { %1336 = vsyncpa [#allocation4 + $0x1], 1 }

</bundles_post_ra>
